<compile_context>
chip_gen: v5e
topology: v5e:2x2
jax: 0.10.0
libtpu: 0.0.40
codegen_flags: <defaults>
</compile_context>

<pallas_src>
import jax
import jax.numpy as jnp
from jax.experimental import pallas as pl
from jax.experimental.pallas import tpu as pltpu

_LANE = 128
_SUBLANE = 8


def _round_up(x, m):
    return (x + m - 1) // m * m


# ----------------------------- Pallas kernel -----------------------------
def _matmul_bias_relu_kernel(p_ref, w_ref, b_ref, o_ref):
    # p_ref: (TM, K) bf16 patch tile, w_ref: (K, C) bf16, b_ref: (1, C) f32.
    acc = jnp.dot(p_ref[...], w_ref[...], preferred_element_type=jnp.float32)
    acc = acc + b_ref[...]
    o_ref[...] = jnp.maximum(acc, 0.0).astype(o_ref.dtype)


def _pallas_matmul_bias_relu(patches, w_mat, b_vec):
    """ReLU(patches @ w_mat + b), M tiled over a parallel grid.

    patches: (M, K) f32, w_mat: (K, Cout) f32, b_vec: (Cout,) f32.
    Returns (M, Cout_pad) f32 where Cout is padded up to a multiple of 128
    lanes (padded output channels are exactly zero).
    """
    M, K = patches.shape
    _, Cout = w_mat.shape

    K_pad = _round_up(K, _LANE)          # lane-aligned contraction dim
    C_pad = _round_up(Cout, _LANE)       # lane-dense output (unmasked stores)
    TM = 256 if M > 256 else _round_up(M, _SUBLANE)
    M_pad = _round_up(M, TM)

    # bf16 MXU inputs, f32 accumulation inside the kernel.
    p = jnp.pad(patches, ((0, M_pad - M), (0, K_pad - K))).astype(jnp.bfloat16)
    w = jnp.pad(w_mat, ((0, K_pad - K), (0, C_pad - Cout))).astype(jnp.bfloat16)
    b = jnp.pad(b_vec, (0, C_pad - Cout)).reshape(1, C_pad).astype(jnp.float32)

    cost = pl.CostEstimate(
        flops=2 * M_pad * K_pad * C_pad,
        transcendentals=0,
        bytes_accessed=(M_pad * K_pad + K_pad * C_pad) * 2
        + C_pad * 4
        + M_pad * C_pad * 4,
    )

    out = pl.pallas_call(
        _matmul_bias_relu_kernel,
        out_shape=jax.ShapeDtypeStruct((M_pad, C_pad), jnp.float32),
        grid=(M_pad // TM,),
        in_specs=[
            pl.BlockSpec((TM, K_pad), lambda i: (i, 0)),     # patch row tile
            pl.BlockSpec((K_pad, C_pad), lambda i: (0, 0)),  # weights, resident
            pl.BlockSpec((1, C_pad), lambda i: (0, 0)),      # bias, resident
        ],
        out_specs=pl.BlockSpec((TM, C_pad), lambda i: (i, 0)),
        compiler_params=pltpu.CompilerParams(
            dimension_semantics=("parallel",),
        ),
        cost_estimate=cost,
    )(p, w, b)
    return out[:M]


# ------------------------- conv layer (im2col glue) -------------------------
def conv2d_relu(x_nhwc, w_oihw, b, stride):
    """VALID conv + bias + ReLU.

    x_nhwc: (N, H, W, Cx) where Cx may carry zero-padded channels (Cx >= Cin).
    w_oihw: (Cout, Cin, KH, KW).
    Returns (N, OH, OW, Cout_pad) with Cout zero-padded to a multiple of 128.
    """
    N, H, W, Cx = x_nhwc.shape
    Cout, Cin, KH, KW = w_oihw.shape
    OH = (H - KH) // stride + 1
    OW = (W - KW) // stride + 1

    # im2col: layout glue in plain JAX, feature ordering (kh, kw, cin).
    cols = [
        x_nhwc[:, i : i + stride * OH : stride, j : j + stride * OW : stride, :]
        for i in range(KH)
        for j in range(KW)
    ]
    patches = jnp.concatenate(cols, axis=-1).reshape(N * OH * OW, KH * KW * Cx)

    # Weight -> (KH*KW*Cx, Cout), matching the (kh, kw, cin) patch ordering.
    # If the activation carries zero-padded channels, pad the Cin axis first
    # (padded channels contribute exactly zero).
    w = w_oihw
    if Cx > Cin:
        w = jnp.pad(w, ((0, 0), (0, Cx - Cin), (0, 0), (0, 0)))
    w_mat = jnp.transpose(w, (2, 3, 1, 0)).reshape(KH * KW * Cx, Cout)

    out = _pallas_matmul_bias_relu(patches, w_mat, b)       # (M, Cout_pad)
    return out.reshape(N, OH, OW, out.shape[-1])


# ------------------------------ Conv module ------------------------------
class ConvPallas:
    """Canonical-architecture Conv from model.py, params initialized like PyTorch."""

    def __init__(self, history_length, key):
        def init_conv(k, cout, cin, kh, kw):
            kw_, kb_ = jax.random.split(k)
            fan_in = cin * kh * kw
            bound = 1.0 / (fan_in ** 0.5)
            w = jax.random.uniform(kw_, (cout, cin, kh, kw), jnp.float32, -bound, bound)
            b = jax.random.uniform(kb_, (cout,), jnp.float32, -bound, bound)
            return w, b

        k1, k2, k3 = jax.random.split(key, 3)
        self.w1, self.b1 = init_conv(k1, 32, history_length, 8, 8)
        self.w2, self.b2 = init_conv(k2, 64, 32, 4, 4)
        self.w3, self.b3 = init_conv(k3, 64, 64, 3, 3)

    def __call__(self, x_nchw):
        x = jnp.transpose(x_nchw, (0, 2, 3, 1))             # NCHW -> NHWC
        x = conv2d_relu(x, self.w1, self.b1, stride=4)      # channels padded to 128
        x = conv2d_relu(x, self.w2, self.b2, stride=2)
        x = conv2d_relu(x, self.w3, self.b3, stride=1)
        x = x[..., : self.w3.shape[0]]                      # drop padded channels
        return jnp.transpose(x, (0, 3, 1, 2))               # NHWC -> NCHW


# ------------------------------ references ------------------------------
def _ref_conv_stack(x_nchw, m: ConvPallas, cast_bf16: bool):
    def conv(x, w, b, s):
        if cast_bf16:
            xc, wc = x.astype(jnp.bfloat16), w.astype(jnp.bfloat16)
        else:
            xc, wc = x, w
        y = jax.lax.conv_general_dilated(
            xc, wc, (s, s), "VALID",
            dimension_numbers=("NCHW", "OIHW", "NCHW"),
            preferred_element_type=jnp.float32,
        )
        return jnp.maximum(y + b[None, :, None, None], 0.0)

    x = conv(x_nchw, m.w1, m.b1, 4)
    x = conv(x, m.w2, m.b2, 2)
    x = conv(x, m.w3, m.b3, 1)
    return x


if __name__ == "__main__":
    key = jax.random.PRNGKey(0)
    k_x, k_p = jax.random.split(key)

    # Small input consistent with the module: batch=2, history_length=4, 52x52
    # (52 -> 12 -> 5 -> 3 spatial through the three VALID convs).
    batch, history_length, spatial = 2, 4, 52
    x = jax.random.normal(k_x, (batch, history_length, spatial, spatial), jnp.float32)

    model = ConvPallas(history_length, k_p)
    forward = jax.jit(model.__call__)

    out = jax.block_until_ready(forward(x))
    assert out.shape == (batch, 64, 3, 3), out.shape

    # Matches a reference using the same bf16-input / f32-accumulate arithmetic.
    ref_bf16 = jax.block_until_ready(_ref_conv_stack(x, model, cast_bf16=True))
    assert jnp.allclose(out, ref_bf16, rtol=5e-3, atol=5e-3), float(
        jnp.max(jnp.abs(out - ref_bf16))
    )

    # Stays close to the exact f32 PyTorch-equivalent conv stack.
    ref_f32 = jax.block_until_ready(_ref_conv_stack(x, model, cast_bf16=False))
    assert jnp.allclose(out, ref_f32, rtol=3e-2, atol=3e-2), float(
        jnp.max(jnp.abs(out - ref_f32))
    )

    print("KERNEL_OK")
</pallas_src>

<mosaic_0001>
module attributes {stable_mosaic.version = 11 : i64} {
  func.func @_matmul_bias_relu_kernel(%arg0: i32, %arg1: memref<256x256xbf16, #tpu.memory_space<vmem>>, %arg2: memref<256x128xbf16, #tpu.memory_space<vmem>>, %arg3: memref<1x128xf32, #tpu.memory_space<vmem>>, %arg4: memref<256x128xf32, #tpu.memory_space<vmem>>) attributes {dimension_semantics = [#tpu.dimension_semantics<parallel>], iteration_bounds = array<i64: 2>, scalar_prefetch = 0 : i64, scratch_operands = 0 : i64, tpu.core_type = #tpu.core_type<tc>, window_params = [{transform_indices = @transform_0, window_bounds = array<i64: 256, 256>}, {pipeline_mode = #tpu.pipeline_mode<synchronous>, transform_indices = @transform_1, window_bounds = array<i64: 256, 128>}, {pipeline_mode = #tpu.pipeline_mode<synchronous>, transform_indices = @transform_2, window_bounds = array<i64: 1, 128>}, {transform_indices = @transform_3, window_bounds = array<i64: 256, 128>}]} {
    %c0 = arith.constant 0 : index
    %c0_0 = arith.constant 0 : index
    %0 = vector.load %arg1[%c0, %c0_0] : memref<256x256xbf16, #tpu.memory_space<vmem>>, vector<256x256xbf16>
    %c0_1 = arith.constant 0 : index
    %c0_2 = arith.constant 0 : index
    %1 = vector.load %arg2[%c0_1, %c0_2] : memref<256x128xbf16, #tpu.memory_space<vmem>>, vector<256x128xbf16>
    %cst = arith.constant dense<0.000000e+00> : vector<256x128xf32>
    %2 = tpu.matmul %0, %1, %cst {dimension_numbers = #tpu.dot_dimension_numbers<[1], [0], [0], [1], [0, 0, 1, 1], [], []>} : vector<256x256xbf16>, vector<256x128xbf16>, vector<256x128xf32> -> vector<256x128xf32>
    %c0_3 = arith.constant 0 : index
    %c0_4 = arith.constant 0 : index
    %3 = vector.load %arg3[%c0_3, %c0_4] : memref<1x128xf32, #tpu.memory_space<vmem>>, vector<1x128xf32>
    %4 = vector.broadcast %3 : vector<1x128xf32> to vector<256x128xf32>
    %5 = arith.addf %2, %4 : vector<256x128xf32>
    %cst_5 = arith.constant 0.000000e+00 : f32
    %6 = vector.broadcast %cst_5 : f32 to vector<256x128xf32>
    %7 = arith.maximumf %5, %6 : vector<256x128xf32>
    %c0_6 = arith.constant 0 : index
    %c0_7 = arith.constant 0 : index
    %8 = vector.load %arg4[%c0_6, %c0_7] : memref<256x128xf32, #tpu.memory_space<vmem>>, vector<256x128xf32>
    tpu.vector_store %arg4[%c0_6, %c0_7], %7 {strides = array<i32>} : memref<256x128xf32, #tpu.memory_space<vmem>>, vector<256x128xf32>,
    return
  }
  func.func @transform_0(%arg0: i32) -> (i32, i32) {
    %c0_i32 = arith.constant 0 : i32
    %c0_i32_0 = arith.constant 0 : i32
    return %arg0, %c0_i32 : i32, i32
  }
  func.func @transform_1(%arg0: i32) -> (i32, i32) {
    %c0_i32 = arith.constant 0 : i32
    %c0_i32_0 = arith.constant 0 : i32
    %c0_i32_1 = arith.constant 0 : i32
    return %c0_i32, %c0_i32_0 : i32, i32
  }
  func.func @transform_2(%arg0: i32) -> (i32, i32) {
    %c0_i32 = arith.constant 0 : i32
    %c0_i32_0 = arith.constant 0 : i32
    %c0_i32_1 = arith.constant 0 : i32
    return %c0_i32, %c0_i32_0 : i32, i32
  }
  func.func @transform_3(%arg0: i32) -> (i32, i32) {
    %c0_i32 = arith.constant 0 : i32
    %c0_i32_0 = arith.constant 0 : i32
    return %arg0, %c0_i32 : i32, i32
  }
}

module attributes {stable_mosaic.version = 11 : i64} {
  func.func @_matmul_bias_relu_kernel(%arg0: i32, %arg1: memref<56x2048xbf16, #tpu.memory_space<vmem>>, %arg2: memref<2048x128xbf16, #tpu.memory_space<vmem>>, %arg3: memref<1x128xf32, #tpu.memory_space<vmem>>, %arg4: memref<56x128xf32, #tpu.memory_space<vmem>>) attributes {dimension_semantics = [#tpu.dimension_semantics<parallel>], iteration_bounds = array<i64: 1>, scalar_prefetch = 0 : i64, scratch_operands = 0 : i64, tpu.core_type = #tpu.core_type<tc>, window_params = [{transform_indices = @transform_0, window_bounds = array<i64: 56, 2048>}, {pipeline_mode = #tpu.pipeline_mode<synchronous>, transform_indices = @transform_1, window_bounds = array<i64: 2048, 128>}, {pipeline_mode = #tpu.pipeline_mode<synchronous>, transform_indices = @transform_2, window_bounds = array<i64: 1, 128>}, {transform_indices = @transform_3, window_bounds = array<i64: 56, 128>}]} {
    %c0 = arith.constant 0 : index
    %c0_0 = arith.constant 0 : index
    %0 = vector.load %arg1[%c0, %c0_0] : memref<56x2048xbf16, #tpu.memory_space<vmem>>, vector<56x2048xbf16>
    %c0_1 = arith.constant 0 : index
    %c0_2 = arith.constant 0 : index
    %1 = vector.load %arg2[%c0_1, %c0_2] : memref<2048x128xbf16, #tpu.memory_space<vmem>>, vector<2048x128xbf16>
    %cst = arith.constant dense<0.000000e+00> : vector<56x128xf32>
    %2 = tpu.matmul %0, %1, %cst {dimension_numbers = #tpu.dot_dimension_numbers<[1], [0], [0], [1], [0, 0, 1, 1], [], []>} : vector<56x2048xbf16>, vector<2048x128xbf16>, vector<56x128xf32> -> vector<56x128xf32>
    %c0_3 = arith.constant 0 : index
    %c0_4 = arith.constant 0 : index
    %3 = vector.load %arg3[%c0_3, %c0_4] : memref<1x128xf32, #tpu.memory_space<vmem>>, vector<1x128xf32>
    %4 = vector.broadcast %3 : vector<1x128xf32> to vector<56x128xf32>
    %5 = arith.addf %2, %4 : vector<56x128xf32>
    %cst_5 = arith.constant 0.000000e+00 : f32
    %6 = vector.broadcast %cst_5 : f32 to vector<56x128xf32>
    %7 = arith.maximumf %5, %6 : vector<56x128xf32>
    %c0_6 = arith.constant 0 : index
    %c0_7 = arith.constant 0 : index
    %8 = vector.load %arg4[%c0_6, %c0_7] : memref<56x128xf32, #tpu.memory_space<vmem>>, vector<56x128xf32>
    tpu.vector_store %arg4[%c0_6, %c0_7], %7 {strides = array<i32>} : memref<56x128xf32, #tpu.memory_space<vmem>>, vector<56x128xf32>,
    return
  }
  func.func @transform_0(%arg0: i32) -> (i32, i32) {
    %c0_i32 = arith.constant 0 : i32
    %c0_i32_0 = arith.constant 0 : i32
    return %arg0, %c0_i32 : i32, i32
  }
  func.func @transform_1(%arg0: i32) -> (i32, i32) {
    %c0_i32 = arith.constant 0 : i32
    %c0_i32_0 = arith.constant 0 : i32
    %c0_i32_1 = arith.constant 0 : i32
    return %c0_i32, %c0_i32_0 : i32, i32
  }
  func.func @transform_2(%arg0: i32) -> (i32, i32) {
    %c0_i32 = arith.constant 0 : i32
    %c0_i32_0 = arith.constant 0 : i32
    %c0_i32_1 = arith.constant 0 : i32
    return %c0_i32, %c0_i32_0 : i32, i32
  }
  func.func @transform_3(%arg0: i32) -> (i32, i32) {
    %c0_i32 = arith.constant 0 : i32
    %c0_i32_0 = arith.constant 0 : i32
    return %arg0, %c0_i32 : i32, i32
  }
}

module attributes {stable_mosaic.version = 11 : i64} {
  func.func @_matmul_bias_relu_kernel(%arg0: i32, %arg1: memref<24x1152xbf16, #tpu.memory_space<vmem>>, %arg2: memref<1152x128xbf16, #tpu.memory_space<vmem>>, %arg3: memref<1x128xf32, #tpu.memory_space<vmem>>, %arg4: memref<24x128xf32, #tpu.memory_space<vmem>>) attributes {dimension_semantics = [#tpu.dimension_semantics<parallel>], iteration_bounds = array<i64: 1>, scalar_prefetch = 0 : i64, scratch_operands = 0 : i64, tpu.core_type = #tpu.core_type<tc>, window_params = [{transform_indices = @transform_0, window_bounds = array<i64: 24, 1152>}, {pipeline_mode = #tpu.pipeline_mode<synchronous>, transform_indices = @transform_1, window_bounds = array<i64: 1152, 128>}, {pipeline_mode = #tpu.pipeline_mode<synchronous>, transform_indices = @transform_2, window_bounds = array<i64: 1, 128>}, {transform_indices = @transform_3, window_bounds = array<i64: 24, 128>}]} {
    %c0 = arith.constant 0 : index
    %c0_0 = arith.constant 0 : index
    %0 = vector.load %arg1[%c0, %c0_0] : memref<24x1152xbf16, #tpu.memory_space<vmem>>, vector<24x1152xbf16>
    %c0_1 = arith.constant 0 : index
    %c0_2 = arith.constant 0 : index
    %1 = vector.load %arg2[%c0_1, %c0_2] : memref<1152x128xbf16, #tpu.memory_space<vmem>>, vector<1152x128xbf16>
    %cst = arith.constant dense<0.000000e+00> : vector<24x128xf32>
    %2 = tpu.matmul %0, %1, %cst {dimension_numbers = #tpu.dot_dimension_numbers<[1], [0], [0], [1], [0, 0, 1, 1], [], []>} : vector<24x1152xbf16>, vector<1152x128xbf16>, vector<24x128xf32> -> vector<24x128xf32>
    %c0_3 = arith.constant 0 : index
    %c0_4 = arith.constant 0 : index
    %3 = vector.load %arg3[%c0_3, %c0_4] : memref<1x128xf32, #tpu.memory_space<vmem>>, vector<1x128xf32>
    %4 = vector.broadcast %3 : vector<1x128xf32> to vector<24x128xf32>
    %5 = arith.addf %2, %4 : vector<24x128xf32>
    %cst_5 = arith.constant 0.000000e+00 : f32
    %6 = vector.broadcast %cst_5 : f32 to vector<24x128xf32>
    %7 = arith.maximumf %5, %6 : vector<24x128xf32>
    %c0_6 = arith.constant 0 : index
    %c0_7 = arith.constant 0 : index
    %8 = vector.load %arg4[%c0_6, %c0_7] : memref<24x128xf32, #tpu.memory_space<vmem>>, vector<24x128xf32>
    tpu.vector_store %arg4[%c0_6, %c0_7], %7 {strides = array<i32>} : memref<24x128xf32, #tpu.memory_space<vmem>>, vector<24x128xf32>,
    return
  }
  func.func @transform_0(%arg0: i32) -> (i32, i32) {
    %c0_i32 = arith.constant 0 : i32
    %c0_i32_0 = arith.constant 0 : i32
    return %arg0, %c0_i32 : i32, i32
  }
  func.func @transform_1(%arg0: i32) -> (i32, i32) {
    %c0_i32 = arith.constant 0 : i32
    %c0_i32_0 = arith.constant 0 : i32
    %c0_i32_1 = arith.constant 0 : i32
    return %c0_i32, %c0_i32_0 : i32, i32
  }
  func.func @transform_2(%arg0: i32) -> (i32, i32) {
    %c0_i32 = arith.constant 0 : i32
    %c0_i32_0 = arith.constant 0 : i32
    %c0_i32_1 = arith.constant 0 : i32
    return %c0_i32, %c0_i32_0 : i32, i32
  }
  func.func @transform_3(%arg0: i32) -> (i32, i32) {
    %c0_i32 = arith.constant 0 : i32
    %c0_i32_0 = arith.constant 0 : i32
    return %arg0, %c0_i32 : i32, i32
  }
}

</mosaic_0001>

<bundles_post_ra>
// kernel: a_call__.3
= control target key start
LH: loop header
LB: loop body
LE: loop exit
PB: predicated region body
PF: predicated region fallthrough
CT: control target
= control target key end

     0   :  { %s1105_s12 = smov 0   ;;  %s1314_s0 = inlined_call_operand.vmem [shape: bf16[512,256], index: 0, kind: input, shape index: {}]   ;;  %s1315_s1 = inlined_call_operand.vmem [shape: bf16[256,128], index: 1, kind: input, shape index: {}]   ;;  %s1316_s2 = inlined_call_operand.vmem [shape: f32[1,128], index: 2, kind: input, shape index: {}]   ;;  %s1317_s3 = inlined_call_operand.vmem [shape: f32[512,128], index: 3, kind: output, shape index: {}]  }
   0x1 LB: > { %s799_s13 = sadd.s32 4294967295, %s1083_s12   ;;  %p803_p0 = scmp.ge.s32.totalorder %s1083_s12, 1  ;;  %s1083_s12 = sphi %s1105_s12, %s13_s12  }
   0x2   : > { %p139_p1 = scmp.lt.s32.totalorder %s1083_s12, 3 }
   0x4   : > { %p140_p2 = pnand %p803_p0, %p139_p1 }
   0x5   : > { %s804_s26 = sshll.u32 (!%p140_p2), %s799_s13, 5 }
   0x6   : > { %143 = sbr.rel (%p140_p2) target bundleno = 302 (0x12e), region = 32  ;;  %p165_p3 = scmp.lt.s32.totalorder (!%p140_p2), %s804_s26, 63 }
   0xb   : > { %v1043_v0 = vld [vmem:[%s1315_s1 + $0x38] sm:$0xff]  ;;  %v1042_v2 = vld [vmem:[%s1315_s1 + $0x30] sm:$0xff]  ;;  %v1041_v4 = vld [vmem:[%s1315_s1 + $0x28] sm:$0xff]  ;;  %s1319_s26 = smov (!%p165_p3, %s804_s26), 63 }
   0xc   : > { %v1051_v1 = vld [vmem:[%s1315_s1 + $0x78] sm:$0xff]  ;;  %501 = vmatpush.bf16.msra.mxu0 %v1043_v0  ;;  %1052 = vmatpush.bf16.msra.mxu2 %v1043_v0  ;;  %v1050_v3 = vld [vmem:[%s1315_s1 + $0x70] sm:$0xff]  ;;  %v1049_v5 = vld [vmem:[%s1315_s1 + $0x68] sm:$0xff]  ;;  %s1003_s13 = sshll.u32 %s1319_s26, 3 }
   0xd   : > { %590 = vmatpush.bf16.msra.mxu1 %v1051_v1  ;;  %1060 = vmatpush.bf16.msra.mxu3 %v1051_v1  ;;  %v1040_v6 = vld [vmem:[%s1315_s1 + $0x20] sm:$0xff]  ;;  %v1039_v8 = vld [vmem:[%s1315_s1 + $0x18] sm:$0xff]  ;;  %v1038_v10 = vld [vmem:[%s1315_s1 + $0x10] sm:$0xff]  ;;  %s1160_s18 = scalar_lea.vmem %s1314_s0, %s1003_s13  ;;  %s1246_s30 = scalar_lea.vmem %s1317_s3, %s1003_s13 }
   0xe   : > { %v1048_v7 = vld [vmem:[%s1315_s1 + $0x60] sm:$0xff]  ;;  %v1047_v9 = vld [vmem:[%s1315_s1 + $0x58] sm:$0xff]  ;;  %v1046_v11 = vld [vmem:[%s1315_s1 + $0x50] sm:$0xff] }
   0xf   : > { %v1037_v12 = vld [vmem:[%s1315_s1 + $0x8] sm:$0xff]  ;;  %v1036_v14 = vld [vmem:[%s1315_s1] sm:$0xff]  ;;  %v819_v28 = vld [vmem:[%s1160_s18 + $0x10] sm:$0xf] }
  0x10   : > { %502 = vmatpush.bf16.msra.mxu0 %v1042_v2  ;;  %1053 = vmatpush.bf16.msra.mxu2 %v1042_v2  ;;  %v1045_v13 = vld [vmem:[%s1315_s1 + $0x48] sm:$0xff]  ;;  %v1044_v15 = vld [vmem:[%s1315_s1 + $0x40] sm:$0xff]  ;;  %v1007_v29 = vld [vmem:[%s1160_s18 + $0x14] sm:$0xf0] }
  0x11   : > { %591 = vmatpush.bf16.msra.mxu1 %v1050_v3  ;;  %1061 = vmatpush.bf16.msra.mxu3 %v1050_v3  ;;  %v811_v16 = vld [vmem:[%s1160_s18] sm:$0xf]  ;;  %v1005_v17 = vld [vmem:[%s1160_s18 + $0x4] sm:$0xf0]  ;;  %v1004_v20 = vld [vmem:[%s1160_s18 + $0x4] sm:$0xf]  ;;  %v820_v36 = vor.u32 %v1007_v29, %v819_v28 }
  0x12   : > { %v875_v18 = vld [vmem:[%s1160_s18 + $0x80] sm:$0xf]  ;;  %v1021_v19 = vld [vmem:[%s1160_s18 + $0x84] sm:$0xf0]  ;;  %v813_v21 = vld [vmem:[%s1160_s18 + $0x8] sm:$0xf0]  ;;  %v812_v24 = vor.u32 %v1005_v17, %v811_v16 }
  0x13   : > { %v1020_v22 = vld [vmem:[%s1160_s18 + $0x84] sm:$0xf]  ;;  %v877_v23 = vld [vmem:[%s1160_s18 + $0x88] sm:$0xf0]  ;;  %v876_v25 = vor.u32 %v1021_v19, %v875_v18  ;;  %v816_v26 = vor.u32 %v1004_v20, %v813_v21  ;;  %v883_v30 = vld [vmem:[%s1160_s18 + $0x90] sm:$0xf] }
  0x14   : > { %503 = vmatpush.bf16.msra.mxu0 %v1041_v4  ;;  %1054 = vmatpush.bf16.msra.mxu2 %v1041_v4  ;;  %v880_v27 = vor.u32 %v1020_v22, %v877_v23  ;;  %v1023_v31 = vld [vmem:[%s1160_s18 + $0x94] sm:$0xf0]  ;;  %v1006_v32 = vld [vmem:[%s1160_s18 + $0x14] sm:$0xf]  ;;  %v821_v33 = vld [vmem:[%s1160_s18 + $0x18] sm:$0xf0] }
  0x15   : > { %592 = vmatpush.bf16.msra.mxu1 %v1049_v5  ;;  %1062 = vmatpush.bf16.msra.mxu3 %v1049_v5  ;;  %v1022_v34 = vld [vmem:[%s1160_s18 + $0x94] sm:$0xf]  ;;  %v885_v35 = vld [vmem:[%s1160_s18 + $0x98] sm:$0xf0]  ;;  %v884_v37 = vor.u32 %v1023_v31, %v883_v30  ;;  %v824_v38 = vor.u32 %v1006_v32, %v821_v33  ;;  %v827_v40 = vld [vmem:[%s1160_s18 + $0x20] sm:$0xf] }
  0x16   : > { %v888_v39 = vor.u32 %v1022_v34, %v885_v35  ;;  %v1009_v41 = vld [vmem:[%s1160_s18 + $0x24] sm:$0xf0]  ;;  %v891_v42 = vld [vmem:[%s1160_s18 + $0xa0] sm:$0xf]  ;;  %v1008_v44 = vld [vmem:[%s1160_s18 + $0x24] sm:$0xf] }
  0x17   : > { %v1025_v43 = vld [vmem:[%s1160_s18 + $0xa4] sm:$0xf0]  ;;  %v829_v45 = vld [vmem:[%s1160_s18 + $0x28] sm:$0xf0]  ;;  %v1024_v46 = vld [vmem:[%s1160_s18 + $0xa4] sm:$0xf]  ;;  %v828_v48 = vor.u32 %v1009_v41, %v827_v40 }
  0x18   : > { %504 = vmatpush.bf16.msra.mxu0 %v1040_v6  ;;  %1055 = vmatpush.bf16.msra.mxu2 %v1040_v6  ;;  %v893_v47 = vld [vmem:[%s1160_s18 + $0xa8] sm:$0xf0]  ;;  %v892_v49 = vor.u32 %v1025_v43, %v891_v42  ;;  %v832_v50 = vor.u32 %v1008_v44, %v829_v45  ;;  %v835_v52 = vld [vmem:[%s1160_s18 + $0x30] sm:$0xf]  ;;  %v1011_v53 = vld [vmem:[%s1160_s18 + $0x34] sm:$0xf0] }
  0x19   : > { %593 = vmatpush.bf16.msra.mxu1 %v1048_v7  ;;  %1063 = vmatpush.bf16.msra.mxu3 %v1048_v7  ;;  %v896_v51 = vor.u32 %v1024_v46, %v893_v47  ;;  %v899_v54 = vld [vmem:[%s1160_s18 + $0xb0] sm:$0xf]  ;;  %v1027_v55 = vld [vmem:[%s1160_s18 + $0xb4] sm:$0xf0]  ;;  %v1010_v56 = vld [vmem:[%s1160_s18 + $0x34] sm:$0xf]  ;;  %v836_v60 = vor.u32 %v1011_v53, %v835_v52 }
  0x1a   : > { %v837_v57 = vld [vmem:[%s1160_s18 + $0x38] sm:$0xf0]  ;;  %v1026_v58 = vld [vmem:[%s1160_s18 + $0xb4] sm:$0xf]  ;;  %v900_v61 = vor.u32 %v1027_v55, %v899_v54  ;;  %v843_v0 = vld [vmem:[%s1160_s18 + $0x40] sm:$0xf] }
  0x1b   : > { %v901_v59 = vld [vmem:[%s1160_s18 + $0xb8] sm:$0xf0]  ;;  %v840_v62 = vor.u32 %v1010_v56, %v837_v57  ;;  %v1013_v1 = vld [vmem:[%s1160_s18 + $0x44] sm:$0xf0]  ;;  %v907_v2 = vld [vmem:[%s1160_s18 + $0xc0] sm:$0xf] }
  0x1c   : > { %505 = vmatpush.bf16.msra.mxu0 %v1039_v8  ;;  %1056 = vmatpush.bf16.msra.mxu2 %v1039_v8  ;;  %v904_v63 = vor.u32 %v1026_v58, %v901_v59  ;;  %v1029_v3 = vld [vmem:[%s1160_s18 + $0xc4] sm:$0xf0]  ;;  %v1012_v4 = vld [vmem:[%s1160_s18 + $0x44] sm:$0xf]  ;;  %v845_v5 = vld [vmem:[%s1160_s18 + $0x48] sm:$0xf0]  ;;  %v844_v8 = vor.u32 %v1013_v1, %v843_v0 }
  0x1d   : > { %594 = vmatpush.bf16.msra.mxu1 %v1047_v9  ;;  %1064 = vmatpush.bf16.msra.mxu3 %v1047_v9  ;;  %v1028_v6 = vld [vmem:[%s1160_s18 + $0xc4] sm:$0xf]  ;;  %v909_v7 = vld [vmem:[%s1160_s18 + $0xc8] sm:$0xf0]  ;;  %v908_v9 = vor.u32 %v1029_v3, %v907_v2  ;;  %v1014_v16 = vld [vmem:[%s1160_s18 + $0x54] sm:$0xf] }
  0x1e   : > { %v853_v17 = vld [vmem:[%s1160_s18 + $0x58] sm:$0xf0]  ;;  %v1030_v18 = vld [vmem:[%s1160_s18 + $0xd4] sm:$0xf]  ;;  %v1016_v28 = vld [vmem:[%s1160_s18 + $0x64] sm:$0xf] }
  0x1f   : > { %v917_v19 = vld [vmem:[%s1160_s18 + $0xd8] sm:$0xf0]  ;;  %v856_v22 = vor.u32 %v1014_v16, %v853_v17  ;;  %v861_v29 = vld [vmem:[%s1160_s18 + $0x68] sm:$0xf0]  ;;  %v1032_v30 = vld [vmem:[%s1160_s18 + $0xe4] sm:$0xf] }
  0x20   : > { %506 = vmatpush.bf16.msra.mxu0 %v1038_v10  ;;  %1057 = vmatpush.bf16.msra.mxu2 %v1038_v10  ;;  %v848_v10 = vor.u32 %v1012_v4, %v845_v5  ;;  %v920_v23 = vor.u32 %v1030_v18, %v917_v19  ;;  %v925_v31 = vld [vmem:[%s1160_s18 + $0xe8] sm:$0xf0]  ;;  %v864_v34 = vor.u32 %v1016_v28, %v861_v29  ;;  %v1018_v40 = vld [vmem:[%s1160_s18 + $0x74] sm:$0xf]  ;;  %v869_v41 = vld [vmem:[%s1160_s18 + $0x78] sm:$0xf0] }
  0x21   : > { %595 = vmatpush.bf16.msra.mxu1 %v1046_v11  ;;  %1065 = vmatpush.bf16.msra.mxu3 %v1046_v11  ;;  %v912_v11 = vor.u32 %v1028_v6, %v909_v7  ;;  %v928_v35 = vor.u32 %v1032_v30, %v925_v31  ;;  %v1034_v42 = vld [vmem:[%s1160_s18 + $0xf4] sm:$0xf]  ;;  %v933_v43 = vld [vmem:[%s1160_s18 + $0xf8] sm:$0xf0]  ;;  %v872_v46 = vor.u32 %v1018_v40, %v869_v41 }
  0x22   : > { %v936_v47 = vor.u32 %v1034_v42, %v933_v43 }
  0x24   : > { %507 = vmatpush.bf16.msra.mxu0 %v1037_v12  ;;  %1058 = vmatpush.bf16.msra.mxu2 %v1037_v12  ;;  %v851_v12 = vld [vmem:[%s1160_s18 + $0x50] sm:$0xf] }
  0x25   : > { %596 = vmatpush.bf16.msra.mxu1 %v1045_v13  ;;  %1066 = vmatpush.bf16.msra.mxu3 %v1045_v13  ;;  %v1015_v13 = vld [vmem:[%s1160_s18 + $0x54] sm:$0xf0] }
  0x26   : > { %v852_v20 = vor.u32 %v1015_v13, %v851_v12 }
  0x28   : > { %508 = vmatpush.bf16.msra.mxu0 %v1036_v14  ;;  %1059 = vmatpush.bf16.msra.mxu2 %v1036_v14  ;;  %v915_v14 = vld [vmem:[%s1160_s18 + $0xd0] sm:$0xf] }
  0x29   : > { %597 = vmatpush.bf16.msra.mxu1 %v1044_v15  ;;  %1067 = vmatpush.bf16.msra.mxu3 %v1044_v15  ;;  %v1031_v15 = vld [vmem:[%s1160_s18 + $0xd4] sm:$0xf0] }
  0x2a   : > { %v916_v21 = vor.u32 %v1031_v15, %v915_v14 }
  0x2b   : > { %509 = vmatmul.bf16.vlgmr.msra.gmra.mxu0 %v812_v24  ;;  %549 = vmatmul.bf16.vlgmr.msra.gmra.mxu2 %v876_v25  ;;  %v859_v24 = vld [vmem:[%s1160_s18 + $0x60] sm:$0xf]  ;;  %v1017_v25 = vld [vmem:[%s1160_s18 + $0x64] sm:$0xf0] }
  0x2c   : > { %598 = vmatmul.bf16.vlgmr.msra.gmra.mxu1 %v816_v26  ;;  %638 = vmatmul.bf16.vlgmr.msra.gmra.mxu3 %v880_v27  ;;  %v923_v26 = vld [vmem:[%s1160_s18 + $0xe0] sm:$0xf]  ;;  %v1033_v27 = vld [vmem:[%s1160_s18 + $0xe4] sm:$0xf0]  ;;  %v860_v32 = vor.u32 %v1017_v25, %v859_v24 }
  0x2d   : > { %v924_v33 = vor.u32 %v1033_v27, %v923_v26 }
  0x3b   : > { %514 = vmatmul.bf16.gmra.mxu0 %v820_v36  ;;  %554 = vmatmul.bf16.gmra.mxu2 %v884_v37  ;;  %v867_v36 = vld [vmem:[%s1160_s18 + $0x70] sm:$0xf]  ;;  %v1019_v37 = vld [vmem:[%s1160_s18 + $0x74] sm:$0xf0] }
  0x3c   : > { %603 = vmatmul.bf16.gmra.mxu1 %v824_v38  ;;  %643 = vmatmul.bf16.gmra.mxu3 %v888_v39  ;;  %v931_v38 = vld [vmem:[%s1160_s18 + $0xf0] sm:$0xf]  ;;  %v1035_v39 = vld [vmem:[%s1160_s18 + $0xf4] sm:$0xf0]  ;;  %v868_v44 = vor.u32 %v1019_v37, %v867_v36 }
  0x3d   : > { %v932_v45 = vor.u32 %v1035_v39, %v931_v38 }
  0x4b   : > { %519 = vmatmul.bf16.gmra.mxu0 %v828_v48  ;;  %559 = vmatmul.bf16.gmra.mxu2 %v892_v49  ;;  %v1238_v48 = vld [vmem:[%s1316_s2] ss:$0 sm:$0xff] }
  0x4c   : > { %608 = vmatmul.bf16.gmra.mxu1 %v832_v50  ;;  %648 = vmatmul.bf16.gmra.mxu3 %v896_v51 }
  0x5b   : > { %524 = vmatmul.bf16.gmra.mxu0 %v836_v60  ;;  %564 = vmatmul.bf16.gmra.mxu2 %v900_v61 }
  0x5c   : > { %613 = vmatmul.bf16.gmra.mxu1 %v840_v62  ;;  %653 = vmatmul.bf16.gmra.mxu3 %v904_v63 }
  0x6b   : > { %529 = vmatmul.bf16.gmra.mxu0 %v844_v8  ;;  %569 = vmatmul.bf16.gmra.mxu2 %v908_v9 }
  0x6c   : > { %618 = vmatmul.bf16.gmra.mxu1 %v848_v10  ;;  %658 = vmatmul.bf16.gmra.mxu3 %v912_v11 }
  0x7b   : > { %534 = vmatmul.bf16.gmra.mxu0 %v852_v20  ;;  %574 = vmatmul.bf16.gmra.mxu2 %v916_v21 }
  0x7c   : > { %623 = vmatmul.bf16.gmra.mxu1 %v856_v22  ;;  %663 = vmatmul.bf16.gmra.mxu3 %v920_v23 }
  0x8b   : > { %539 = vmatmul.bf16.gmra.mxu0 %v860_v32  ;;  %579 = vmatmul.bf16.gmra.mxu2 %v924_v33 }
  0x8c   : > { %628 = vmatmul.bf16.gmra.mxu1 %v864_v34  ;;  %668 = vmatmul.bf16.gmra.mxu3 %v928_v35 }
  0x9b   : > { %544 = vmatmul.bf16.gmra.mxu0 %v868_v44  ;;  %584 = vmatmul.bf16.gmra.mxu2 %v932_v45 }
  0x9c   : > { %633 = vmatmul.bf16.gmra.mxu1 %v872_v46  ;;  %673 = vmatmul.bf16.gmra.mxu3 %v936_v47 }
  0xa8   : > { %v510_v49 = vpop.f32.mrf.mxu0 }
  0xa9   : > { %v511_v50 = vadd.f32 %v1238_v48, %v510_v49  ;;  %v599_v51 = vpop.f32.mrf.mxu1 }
  0xab   : > { %v600_v52 = vadd.f32 %v599_v51, %v511_v50 }
  0xad   : > { %v679_v53 = vmax.f32 %v600_v52, 0.0 }
  0xae   : > { %v550_v54 = vpop.f32.mrf.mxu2 }
  0xaf   : > { %711 = vst [vmem:[%s1246_s30] sm:$0xff] %v679_v53  ;;  %v551_v55 = vadd.f32 %v1238_v48, %v550_v54  ;;  %v639_v56 = vpop.f32.mrf.mxu3 }
  0xb0   : > { %v512_v57 = vpop.f32.mrf.mxu0 }
  0xb1   : > { %v640_v58 = vadd.f32 %v639_v56, %v551_v55  ;;  %v513_v59 = vadd.f32 %v1238_v48, %v512_v57  ;;  %v601_v60 = vpop.f32.mrf.mxu1 }
  0xb3   : > { %v695_v61 = vmax.f32 %v640_v58, 0.0  ;;  %v602_v62 = vadd.f32 %v601_v60, %v513_v59 }
  0xb5   : > { %727 = vst [vmem:[%s1246_s30 + $0x80] sm:$0xff] %v695_v61  ;;  %v680_v63 = vmax.f32 %v602_v62, 0.0 }
  0xb6   : > { %v552_v0 = vpop.f32.mrf.mxu2 }
  0xb7   : > { %712 = vst [vmem:[%s1246_s30 + $0x8] sm:$0xff] %v680_v63  ;;  %v553_v1 = vadd.f32 %v1238_v48, %v552_v0  ;;  %v641_v2 = vpop.f32.mrf.mxu3 }
  0xb8   : > { %v515_v3 = vpop.f32.mrf.mxu0 }
  0xb9   : > { %v642_v4 = vadd.f32 %v641_v2, %v553_v1  ;;  %v516_v5 = vadd.f32 %v1238_v48, %v515_v3  ;;  %v604_v6 = vpop.f32.mrf.mxu1 }
  0xbb   : > { %v696_v7 = vmax.f32 %v642_v4, 0.0  ;;  %v605_v8 = vadd.f32 %v604_v6, %v516_v5 }
  0xbd   : > { %728 = vst [vmem:[%s1246_s30 + $0x88] sm:$0xff] %v696_v7  ;;  %v681_v9 = vmax.f32 %v605_v8, 0.0 }
  0xbe   : > { %v555_v10 = vpop.f32.mrf.mxu2 }
  0xbf   : > { %713 = vst [vmem:[%s1246_s30 + $0x10] sm:$0xff] %v681_v9  ;;  %v556_v11 = vadd.f32 %v1238_v48, %v555_v10  ;;  %v644_v12 = vpop.f32.mrf.mxu3 }
  0xc0   : > { %v517_v13 = vpop.f32.mrf.mxu0 }
  0xc1   : > { %v645_v14 = vadd.f32 %v644_v12, %v556_v11  ;;  %v518_v15 = vadd.f32 %v1238_v48, %v517_v13  ;;  %v606_v16 = vpop.f32.mrf.mxu1 }
  0xc3   : > { %v697_v17 = vmax.f32 %v645_v14, 0.0  ;;  %v607_v18 = vadd.f32 %v606_v16, %v518_v15 }
  0xc5   : > { %729 = vst [vmem:[%s1246_s30 + $0x90] sm:$0xff] %v697_v17  ;;  %v682_v19 = vmax.f32 %v607_v18, 0.0 }
  0xc6   : > { %v557_v20 = vpop.f32.mrf.mxu2 }
  0xc7   : > { %714 = vst [vmem:[%s1246_s30 + $0x18] sm:$0xff] %v682_v19  ;;  %v558_v21 = vadd.f32 %v1238_v48, %v557_v20  ;;  %v646_v22 = vpop.f32.mrf.mxu3 }
  0xc8   : > { %v520_v23 = vpop.f32.mrf.mxu0 }
  0xc9   : > { %v647_v24 = vadd.f32 %v646_v22, %v558_v21  ;;  %v521_v25 = vadd.f32 %v1238_v48, %v520_v23  ;;  %v609_v26 = vpop.f32.mrf.mxu1 }
  0xcb   : > { %v698_v27 = vmax.f32 %v647_v24, 0.0  ;;  %v610_v28 = vadd.f32 %v609_v26, %v521_v25 }
  0xcd   : > { %730 = vst [vmem:[%s1246_s30 + $0x98] sm:$0xff] %v698_v27  ;;  %v683_v29 = vmax.f32 %v610_v28, 0.0 }
  0xce   : > { %v560_v30 = vpop.f32.mrf.mxu2 }
  0xcf   : > { %715 = vst [vmem:[%s1246_s30 + $0x20] sm:$0xff] %v683_v29  ;;  %v561_v31 = vadd.f32 %v1238_v48, %v560_v30  ;;  %v649_v32 = vpop.f32.mrf.mxu3 }
  0xd0   : > { %v522_v33 = vpop.f32.mrf.mxu0 }
  0xd1   : > { %v650_v34 = vadd.f32 %v649_v32, %v561_v31  ;;  %v523_v35 = vadd.f32 %v1238_v48, %v522_v33  ;;  %v611_v36 = vpop.f32.mrf.mxu1 }
  0xd3   : > { %v699_v37 = vmax.f32 %v650_v34, 0.0  ;;  %v612_v38 = vadd.f32 %v611_v36, %v523_v35 }
  0xd5   : > { %731 = vst [vmem:[%s1246_s30 + $0xa0] sm:$0xff] %v699_v37  ;;  %v684_v39 = vmax.f32 %v612_v38, 0.0 }
  0xd6   : > { %v562_v40 = vpop.f32.mrf.mxu2 }
  0xd7   : > { %716 = vst [vmem:[%s1246_s30 + $0x28] sm:$0xff] %v684_v39  ;;  %v563_v41 = vadd.f32 %v1238_v48, %v562_v40  ;;  %v651_v42 = vpop.f32.mrf.mxu3 }
  0xd8   : > { %v525_v43 = vpop.f32.mrf.mxu0 }
  0xd9   : > { %v652_v44 = vadd.f32 %v651_v42, %v563_v41  ;;  %v526_v45 = vadd.f32 %v1238_v48, %v525_v43  ;;  %v614_v46 = vpop.f32.mrf.mxu1 }
  0xdb   : > { %v700_v47 = vmax.f32 %v652_v44, 0.0  ;;  %v615_v49 = vadd.f32 %v614_v46, %v526_v45 }
  0xdd   : > { %732 = vst [vmem:[%s1246_s30 + $0xa8] sm:$0xff] %v700_v47  ;;  %v685_v50 = vmax.f32 %v615_v49, 0.0 }
  0xde   : > { %v565_v51 = vpop.f32.mrf.mxu2 }
  0xdf   : > { %717 = vst [vmem:[%s1246_s30 + $0x30] sm:$0xff] %v685_v50  ;;  %v566_v52 = vadd.f32 %v1238_v48, %v565_v51  ;;  %v654_v53 = vpop.f32.mrf.mxu3 }
  0xe0   : > { %v527_v54 = vpop.f32.mrf.mxu0 }
  0xe1   : > { %v655_v55 = vadd.f32 %v654_v53, %v566_v52  ;;  %v528_v56 = vadd.f32 %v1238_v48, %v527_v54  ;;  %v616_v57 = vpop.f32.mrf.mxu1 }
  0xe3   : > { %v701_v58 = vmax.f32 %v655_v55, 0.0  ;;  %v617_v59 = vadd.f32 %v616_v57, %v528_v56 }
  0xe5   : > { %733 = vst [vmem:[%s1246_s30 + $0xb0] sm:$0xff] %v701_v58  ;;  %v686_v60 = vmax.f32 %v617_v59, 0.0 }
  0xe6   : > { %v567_v61 = vpop.f32.mrf.mxu2 }
  0xe7   : > { %718 = vst [vmem:[%s1246_s30 + $0x38] sm:$0xff] %v686_v60  ;;  %v568_v62 = vadd.f32 %v1238_v48, %v567_v61  ;;  %v656_v63 = vpop.f32.mrf.mxu3 }
  0xe8   : > { %v530_v0 = vpop.f32.mrf.mxu0 }
  0xe9   : > { %v657_v1 = vadd.f32 %v656_v63, %v568_v62  ;;  %v531_v2 = vadd.f32 %v1238_v48, %v530_v0  ;;  %v619_v3 = vpop.f32.mrf.mxu1 }
  0xeb   : > { %v702_v4 = vmax.f32 %v657_v1, 0.0  ;;  %v620_v5 = vadd.f32 %v619_v3, %v531_v2 }
  0xed   : > { %734 = vst [vmem:[%s1246_s30 + $0xb8] sm:$0xff] %v702_v4  ;;  %v687_v6 = vmax.f32 %v620_v5, 0.0 }
  0xee   : > { %v570_v7 = vpop.f32.mrf.mxu2 }
  0xef   : > { %719 = vst [vmem:[%s1246_s30 + $0x40] sm:$0xff] %v687_v6  ;;  %v571_v8 = vadd.f32 %v1238_v48, %v570_v7  ;;  %v659_v9 = vpop.f32.mrf.mxu3 }
  0xf0   : > { %v532_v10 = vpop.f32.mrf.mxu0 }
  0xf1   : > { %v660_v11 = vadd.f32 %v659_v9, %v571_v8  ;;  %v533_v12 = vadd.f32 %v1238_v48, %v532_v10  ;;  %v621_v13 = vpop.f32.mrf.mxu1 }
  0xf3   : > { %v703_v14 = vmax.f32 %v660_v11, 0.0  ;;  %v622_v15 = vadd.f32 %v621_v13, %v533_v12 }
  0xf5   : > { %735 = vst [vmem:[%s1246_s30 + $0xc0] sm:$0xff] %v703_v14  ;;  %v688_v16 = vmax.f32 %v622_v15, 0.0 }
  0xf6   : > { %v572_v17 = vpop.f32.mrf.mxu2 }
  0xf7   : > { %720 = vst [vmem:[%s1246_s30 + $0x48] sm:$0xff] %v688_v16  ;;  %v573_v18 = vadd.f32 %v1238_v48, %v572_v17  ;;  %v661_v19 = vpop.f32.mrf.mxu3 }
  0xf8   : > { %v535_v20 = vpop.f32.mrf.mxu0 }
  0xf9   : > { %v662_v21 = vadd.f32 %v661_v19, %v573_v18  ;;  %v536_v22 = vadd.f32 %v1238_v48, %v535_v20  ;;  %v624_v23 = vpop.f32.mrf.mxu1 }
  0xfb   : > { %v704_v24 = vmax.f32 %v662_v21, 0.0  ;;  %v625_v25 = vadd.f32 %v624_v23, %v536_v22 }
  0xfd   : > { %736 = vst [vmem:[%s1246_s30 + $0xc8] sm:$0xff] %v704_v24  ;;  %v689_v26 = vmax.f32 %v625_v25, 0.0 }
  0xfe   : > { %v575_v27 = vpop.f32.mrf.mxu2 }
  0xff   : > { %721 = vst [vmem:[%s1246_s30 + $0x50] sm:$0xff] %v689_v26  ;;  %v576_v28 = vadd.f32 %v1238_v48, %v575_v27  ;;  %v664_v29 = vpop.f32.mrf.mxu3 }
 0x100   : > { %v537_v30 = vpop.f32.mrf.mxu0 }
 0x101   : > { %v665_v31 = vadd.f32 %v664_v29, %v576_v28  ;;  %v538_v32 = vadd.f32 %v1238_v48, %v537_v30  ;;  %v626_v33 = vpop.f32.mrf.mxu1 }
 0x103   : > { %v705_v34 = vmax.f32 %v665_v31, 0.0  ;;  %v627_v35 = vadd.f32 %v626_v33, %v538_v32 }
 0x105   : > { %737 = vst [vmem:[%s1246_s30 + $0xd0] sm:$0xff] %v705_v34  ;;  %v690_v36 = vmax.f32 %v627_v35, 0.0 }
 0x106   : > { %v577_v37 = vpop.f32.mrf.mxu2 }
 0x107   : > { %722 = vst [vmem:[%s1246_s30 + $0x58] sm:$0xff] %v690_v36  ;;  %v578_v38 = vadd.f32 %v1238_v48, %v577_v37  ;;  %v666_v39 = vpop.f32.mrf.mxu3 }
 0x108   : > { %v540_v40 = vpop.f32.mrf.mxu0 }
 0x109   : > { %v667_v41 = vadd.f32 %v666_v39, %v578_v38  ;;  %v541_v42 = vadd.f32 %v1238_v48, %v540_v40  ;;  %v629_v43 = vpop.f32.mrf.mxu1 }
 0x10b   : > { %v706_v44 = vmax.f32 %v667_v41, 0.0  ;;  %v630_v45 = vadd.f32 %v629_v43, %v541_v42 }
 0x10d   : > { %738 = vst [vmem:[%s1246_s30 + $0xd8] sm:$0xff] %v706_v44  ;;  %v691_v46 = vmax.f32 %v630_v45, 0.0 }
 0x10e   : > { %v580_v47 = vpop.f32.mrf.mxu2 }
 0x10f   : > { %723 = vst [vmem:[%s1246_s30 + $0x60] sm:$0xff] %v691_v46  ;;  %v581_v49 = vadd.f32 %v1238_v48, %v580_v47  ;;  %v669_v50 = vpop.f32.mrf.mxu3 }
 0x110   : > { %v542_v51 = vpop.f32.mrf.mxu0 }
 0x111   : > { %v670_v52 = vadd.f32 %v669_v50, %v581_v49  ;;  %v543_v53 = vadd.f32 %v1238_v48, %v542_v51  ;;  %v631_v54 = vpop.f32.mrf.mxu1 }
 0x113   : > { %v707_v55 = vmax.f32 %v670_v52, 0.0  ;;  %v632_v56 = vadd.f32 %v631_v54, %v543_v53 }
 0x115   : > { %739 = vst [vmem:[%s1246_s30 + $0xe0] sm:$0xff] %v707_v55  ;;  %v692_v57 = vmax.f32 %v632_v56, 0.0 }
 0x116   : > { %v582_v58 = vpop.f32.mrf.mxu2 }
 0x117   : > { %724 = vst [vmem:[%s1246_s30 + $0x68] sm:$0xff] %v692_v57  ;;  %v583_v59 = vadd.f32 %v1238_v48, %v582_v58  ;;  %v671_v60 = vpop.f32.mrf.mxu3 }
 0x118   : > { %v545_v61 = vpop.f32.mrf.mxu0 }
 0x119   : > { %v672_v62 = vadd.f32 %v671_v60, %v583_v59  ;;  %v546_v63 = vadd.f32 %v1238_v48, %v545_v61  ;;  %v634_v0 = vpop.f32.mrf.mxu1 }
 0x11b   : > { %v708_v1 = vmax.f32 %v672_v62, 0.0  ;;  %v635_v2 = vadd.f32 %v634_v0, %v546_v63 }
 0x11d   : > { %740 = vst [vmem:[%s1246_s30 + $0xe8] sm:$0xff] %v708_v1  ;;  %v693_v3 = vmax.f32 %v635_v2, 0.0 }
 0x11e   : > { %v585_v4 = vpop.f32.mrf.mxu2 }
 0x11f   : > { %725 = vst [vmem:[%s1246_s30 + $0x70] sm:$0xff] %v693_v3  ;;  %v586_v5 = vadd.f32 %v1238_v48, %v585_v4  ;;  %v674_v6 = vpop.f32.mrf.mxu3 }
 0x120   : > { %v547_v7 = vpop.f32.mrf.mxu0 }
 0x121   : > { %v675_v8 = vadd.f32 %v674_v6, %v586_v5  ;;  %v548_v9 = vadd.f32 %v1238_v48, %v547_v7  ;;  %v636_v10 = vpop.f32.mrf.mxu1 }
 0x123   : > { %v709_v11 = vmax.f32 %v675_v8, 0.0  ;;  %v637_v12 = vadd.f32 %v636_v10, %v548_v9 }
 0x125   : > { %741 = vst [vmem:[%s1246_s30 + $0xf0] sm:$0xff] %v709_v11  ;;  %v694_v13 = vmax.f32 %v637_v12, 0.0 }
 0x126   : > { %v587_v14 = vpop.f32.mrf.mxu2 }
 0x127   : > { %726 = vst [vmem:[%s1246_s30 + $0x78] sm:$0xff] %v694_v13  ;;  %v588_v15 = vadd.f32 %v1238_v48, %v587_v14  ;;  %v676_v16 = vpop.f32.mrf.mxu3 }
 0x129   : > { %v677_v17 = vadd.f32 %v676_v16, %v588_v15 }
 0x12b   : > { %v710_v18 = vmax.f32 %v677_v17, 0.0 }
 0x12d   : > { %742 = vst [vmem:[%s1246_s30 + $0xf8] sm:$0xff] %v710_v18 }
 0x12e PF: > { %s13_s12 = sadd.s32 1, %s1083_s12  }
 0x12f   : > { %p10_p4 = scmp.ge.s32.totalorder %s13_s12, 4  }
 0x131   :  { %12 = sbr.rel (!%p10_p4) target bundleno = 1 (0x1), region = 62 }

// kernel: a_call__.5
= control target key start
LH: loop header
LB: loop body
LE: loop exit
PB: predicated region body
PF: predicated region fallthrough
CT: control target
= control target key end

     0   :  { %s1590_s1 = inlined_call_operand.vmem [shape: bf16[1152,128], index: 1, kind: input, shape index: {}]   ;;  %s1591_s2 = inlined_call_operand.vmem [shape: f32[1,128], index: 2, kind: input, shape index: {}]   ;;  %s1592_s0 = inlined_call_operand.vmem [shape: bf16[24,1152], index: 0, kind: input, shape index: {}]   ;;  %s1593_s3 = inlined_call_operand.vmem [shape: f32[24,128], index: 3, kind: output, shape index: {}]  }
   0x1   :  { %v1199_v0 = vld [vmem:[%s1590_s1 + $0x38] sm:$0xff]  ;;  %v1198_v4 = vld [vmem:[%s1590_s1 + $0x30] sm:$0xff]  ;;  %v1197_v8 = vld [vmem:[%s1590_s1 + $0x28] sm:$0xff] }
   0x2   :  { %v1207_v1 = vld [vmem:[%s1590_s1 + $0x78] sm:$0xff]  ;;  %687 = vmatpush.bf16.msra.mxu0 %v1199_v0  ;;  %v1206_v5 = vld [vmem:[%s1590_s1 + $0x70] sm:$0xff]  ;;  %v1205_v9 = vld [vmem:[%s1590_s1 + $0x68] sm:$0xff] }
   0x3   :  { %v1215_v2 = vld [vmem:[%s1590_s1 + $0xb8] sm:$0xff]  ;;  %705 = vmatpush.bf16.msra.mxu1 %v1207_v1  ;;  %v1214_v6 = vld [vmem:[%s1590_s1 + $0xb0] sm:$0xff]  ;;  %v1213_v10 = vld [vmem:[%s1590_s1 + $0xa8] sm:$0xff] }
   0x4   :  { %v1223_v3 = vld [vmem:[%s1590_s1 + $0xf8] sm:$0xff]  ;;  %723 = vmatpush.bf16.msra.mxu2 %v1215_v2  ;;  %v1222_v7 = vld [vmem:[%s1590_s1 + $0xf0] sm:$0xff]  ;;  %v1221_v11 = vld [vmem:[%s1590_s1 + $0xe8] sm:$0xff] }
   0x5   :  { %741 = vmatpush.bf16.msra.mxu3 %v1223_v3  ;;  %v1196_v12 = vld [vmem:[%s1590_s1 + $0x20] sm:$0xff]  ;;  %v1195_v16 = vld [vmem:[%s1590_s1 + $0x18] sm:$0xff]  ;;  %v1194_v20 = vld [vmem:[%s1590_s1 + $0x10] sm:$0xff] }
   0x6   :  { %688 = vmatpush.bf16.msra.mxu0 %v1198_v4  ;;  %v1204_v13 = vld [vmem:[%s1590_s1 + $0x60] sm:$0xff]  ;;  %v1203_v17 = vld [vmem:[%s1590_s1 + $0x58] sm:$0xff]  ;;  %v1202_v21 = vld [vmem:[%s1590_s1 + $0x50] sm:$0xff] }
   0x7   :  { %706 = vmatpush.bf16.msra.mxu1 %v1206_v5  ;;  %v1212_v14 = vld [vmem:[%s1590_s1 + $0xa0] sm:$0xff]  ;;  %v1211_v18 = vld [vmem:[%s1590_s1 + $0x98] sm:$0xff]  ;;  %v1210_v22 = vld [vmem:[%s1590_s1 + $0x90] sm:$0xff] }
   0x8   :  { %724 = vmatpush.bf16.msra.mxu2 %v1214_v6  ;;  %v1220_v15 = vld [vmem:[%s1590_s1 + $0xe0] sm:$0xff]  ;;  %v1219_v19 = vld [vmem:[%s1590_s1 + $0xd8] sm:$0xff]  ;;  %v1218_v23 = vld [vmem:[%s1590_s1 + $0xd0] sm:$0xff] }
   0x9   :  { %742 = vmatpush.bf16.msra.mxu3 %v1222_v7  ;;  %v1193_v24 = vld [vmem:[%s1590_s1 + $0x8] sm:$0xff]  ;;  %v1192_v28 = vld [vmem:[%s1590_s1] sm:$0xff]  ;;  %v871_v39 = vld [vmem:[%s1592_s0 + $0x2c] sm:$0xf0] }
   0xa   :  { %689 = vmatpush.bf16.msra.mxu0 %v1197_v8  ;;  %v1201_v25 = vld [vmem:[%s1590_s1 + $0x48] sm:$0xff]  ;;  %v1200_v29 = vld [vmem:[%s1590_s1 + $0x40] sm:$0xff]  ;;  %v1231_v40 = vld [vmem:[%s1590_s1 + $0x138] sm:$0xff] }
   0xb   :  { %707 = vmatpush.bf16.msra.mxu1 %v1205_v9  ;;  %v1209_v26 = vld [vmem:[%s1590_s1 + $0x88] sm:$0xff]  ;;  %v1208_v30 = vld [vmem:[%s1590_s1 + $0x80] sm:$0xff]  ;;  %v1239_v41 = vld [vmem:[%s1590_s1 + $0x178] sm:$0xff] }
   0xc   :  { %725 = vmatpush.bf16.msra.mxu2 %v1213_v10  ;;  %v1217_v27 = vld [vmem:[%s1590_s1 + $0xc8] sm:$0xff]  ;;  %v1216_v31 = vld [vmem:[%s1590_s1 + $0xc0] sm:$0xff]  ;;  %v1247_v46 = vld [vmem:[%s1590_s1 + $0x1b8] sm:$0xff] }
   0xd   :  { %743 = vmatpush.bf16.msra.mxu3 %v1221_v11  ;;  %v861_v32 = vld [vmem:[%s1592_s0] sm:$0xf]  ;;  %v1187_v33 = vld [vmem:[%s1592_s0 + $0x20] sm:$0xf0]  ;;  %v863_v35 = vld [vmem:[%s1592_s0 + $0x24] sm:$0xf0] }
   0xe   :  { %690 = vmatpush.bf16.msra.mxu0 %v1196_v12  ;;  %v1183_v34 = vld [vmem:[%s1592_s0 + $0x4] sm:$0xf]  ;;  %v869_v36 = vld [vmem:[%s1592_s0 + $0x8] sm:$0xf]  ;;  %v1188_v37 = vld [vmem:[%s1592_s0 + $0x28] sm:$0xf0]  ;;  %v862_v42 = vor.u32 %v1187_v33, %v861_v32 }
   0xf   :  { %708 = vmatpush.bf16.msra.mxu1 %v1204_v13  ;;  %v1184_v38 = vld [vmem:[%s1592_s0 + $0xc] sm:$0xf]  ;;  %v866_v43 = vor.u32 %v1183_v34, %v863_v35  ;;  %v870_v44 = vor.u32 %v1188_v37, %v869_v36  ;;  %v1255_v47 = vld [vmem:[%s1590_s1 + $0x1f8] sm:$0xff]  ;;  %v1230_v48 = vld [vmem:[%s1590_s1 + $0x130] sm:$0xff] }
  0x10   :  { %726 = vmatpush.bf16.msra.mxu2 %v1212_v14  ;;  %v874_v45 = vor.u32 %v1184_v38, %v871_v39  ;;  %v1238_v49 = vld [vmem:[%s1590_s1 + $0x170] sm:$0xff]  ;;  %v1229_v52 = vld [vmem:[%s1590_s1 + $0x128] sm:$0xff]  ;;  %v1228_v58 = vld [vmem:[%s1590_s1 + $0x120] sm:$0xff] }
  0x11   :  { %744 = vmatpush.bf16.msra.mxu3 %v1220_v15  ;;  %v1246_v50 = vld [vmem:[%s1590_s1 + $0x1b0] sm:$0xff]  ;;  %v1237_v53 = vld [vmem:[%s1590_s1 + $0x168] sm:$0xff]  ;;  %v1236_v59 = vld [vmem:[%s1590_s1 + $0x160] sm:$0xff] }
  0x12   :  { %691 = vmatpush.bf16.msra.mxu0 %v1195_v16  ;;  %v1254_v51 = vld [vmem:[%s1590_s1 + $0x1f0] sm:$0xff]  ;;  %v24_v54 = vld [vmem:[%s1592_s0 + $0x48] sm:$0xff]  ;;  %v1244_v0 = vld [vmem:[%s1590_s1 + $0x1a0] sm:$0xff] }
  0x13   :  { %709 = vmatpush.bf16.msra.mxu1 %v1203_v17  ;;  %v1245_v55 = vld [vmem:[%s1590_s1 + $0x1a8] sm:$0xff]  ;;  %v25_v57 = vld [vmem:[%s1592_s0 + $0x50] sm:$0xff]  ;;  %v210_v60 = vunpack.c.l.b16 %v24_v54  ;;  %v211_v61 = vunpack.c.h.b16 %v24_v54  ;;  %v1252_v1 = vld [vmem:[%s1590_s1 + $0x1e0] sm:$0xff] }
  0x14   :  { %727 = vmatpush.bf16.msra.mxu2 %v1211_v18  ;;  %v1253_v56 = vld [vmem:[%s1590_s1 + $0x1e8] sm:$0xff]  ;;  %v212_v62 = vunpack.c.l.b16 %v25_v57  ;;  %v213_v63 = vunpack.c.h.b16 %v25_v57  ;;  %v1227_v2 = vld [vmem:[%s1590_s1 + $0x118] sm:$0xff]  ;;  %v1226_v10 = vld [vmem:[%s1590_s1 + $0x110] sm:$0xff] }
  0x15   :  { %745 = vmatpush.bf16.msra.mxu3 %v1219_v19  ;;  %v1235_v3 = vld [vmem:[%s1590_s1 + $0x158] sm:$0xff]  ;;  %v228_v4 = vpack.c.b16 %v210_v60, %v210_v60  ;;  %v229_v5 = vpack.c.b16 %v211_v61, %v211_v61  ;;  %v1234_v11 = vld [vmem:[%s1590_s1 + $0x150] sm:$0xff]  ;;  %v1225_v14 = vld [vmem:[%s1590_s1 + $0x108] sm:$0xff] }
  0x16   :  { %692 = vmatpush.bf16.msra.mxu0 %v1194_v20  ;;  %v230_v6 = vpack.c.b16 %v212_v62, %v212_v62  ;;  %v231_v7 = vpack.c.b16 %v213_v63, %v213_v63  ;;  %v1243_v8 = vld [vmem:[%s1590_s1 + $0x198] sm:$0xff]  ;;  %v1242_v12 = vld [vmem:[%s1590_s1 + $0x190] sm:$0xff]  ;;  %v1233_v15 = vld [vmem:[%s1590_s1 + $0x148] sm:$0xff] }
  0x17   :  { %710 = vmatpush.bf16.msra.mxu1 %v1202_v21  ;;  %v1251_v9 = vld [vmem:[%s1590_s1 + $0x1d8] sm:$0xff]  ;;  %v1250_v13 = vld [vmem:[%s1590_s1 + $0x1d0] sm:$0xff]  ;;  %v1241_v16 = vld [vmem:[%s1590_s1 + $0x188] sm:$0xff] }
  0x18   :  { %728 = vmatpush.bf16.msra.mxu2 %v1210_v22  ;;  %v1249_v17 = vld [vmem:[%s1590_s1 + $0x1c8] sm:$0xff]  ;;  %v1224_v18 = vld [vmem:[%s1590_s1 + $0x100] sm:$0xff]  ;;  %v877_v22 = vld [vmem:[%s1592_s0 + $0x10] sm:$0xf] }
  0x19   :  { %746 = vmatpush.bf16.msra.mxu3 %v1218_v23  ;;  %v1232_v19 = vld [vmem:[%s1590_s1 + $0x140] sm:$0xff]  ;;  %v1189_v23 = vld [vmem:[%s1592_s0 + $0x30] sm:$0xf0]  ;;  %v1261_v36 = vld [vmem:[%s1590_s1 + $0x228] sm:$0xff] }
  0x1a   :  { %693 = vmatpush.bf16.msra.mxu0 %v1193_v24  ;;  %v1240_v20 = vld [vmem:[%s1590_s1 + $0x180] sm:$0xff]  ;;  %v1263_v24 = vld [vmem:[%s1590_s1 + $0x238] sm:$0xff]  ;;  %v1262_v35 = vld [vmem:[%s1590_s1 + $0x230] sm:$0xff] }
  0x1b   :  { %711 = vmatpush.bf16.msra.mxu1 %v1201_v25  ;;  %v1248_v21 = vld [vmem:[%s1590_s1 + $0x1c0] sm:$0xff]  ;;  %v1185_v25 = vld [vmem:[%s1592_s0 + $0x14] sm:$0xf]  ;;  %v26_v37 = vld [vmem:[%s1592_s0 + $0x58] sm:$0xff] }
  0x1c   :  { %729 = vmatpush.bf16.msra.mxu2 %v1209_v26  ;;  %v879_v26 = vld [vmem:[%s1592_s0 + $0x34] sm:$0xf0]  ;;  %v1260_v38 = vld [vmem:[%s1590_s1 + $0x220] sm:$0xff] }
  0x1d   :  { %747 = vmatpush.bf16.msra.mxu3 %v1217_v27  ;;  %v885_v27 = vld [vmem:[%s1592_s0 + $0x18] sm:$0xf]  ;;  %v882_v32 = vor.u32 %v1185_v25, %v879_v26  ;;  %v27_v39 = vld [vmem:[%s1592_s0 + $0x60] sm:$0xff] }
  0x1e   :  { %694 = vmatpush.bf16.msra.mxu0 %v1192_v28  ;;  %v1190_v28 = vld [vmem:[%s1592_s0 + $0x38] sm:$0xf0]  ;;  %v893_v54 = vld [vmem:[%s1592_s0 + $0x20] sm:$0xf] }
  0x1f   :  { %712 = vmatpush.bf16.msra.mxu1 %v1200_v29  ;;  %v1186_v29 = vld [vmem:[%s1592_s0 + $0x1c] sm:$0xf]  ;;  %v886_v33 = vor.u32 %v1190_v28, %v885_v27 }
  0x20   :  { %730 = vmatpush.bf16.msra.mxu2 %v1208_v30  ;;  %v887_v30 = vld [vmem:[%s1592_s0 + $0x3c] sm:$0xf0] }
  0x21   :  { %748 = vmatpush.bf16.msra.mxu3 %v1216_v31  ;;  %695 = vmatmul.bf16.vlgmr.msra.gmra.mxu0 %v862_v42  ;;  %v878_v31 = vor.u32 %v1189_v23, %v877_v22  ;;  %v890_v34 = vor.u32 %v1186_v29, %v887_v30  ;;  %v216_v42 = vunpack.c.l.b16 %v27_v39 }
  0x22   :  { %759 = vmatpush.bf16.msrb.mxu0 %v1231_v40  ;;  %713 = vmatmul.bf16.vlgmr.msra.gmra.mxu1 %v866_v43  ;;  %v214_v40 = vunpack.c.l.b16 %v26_v37  ;;  %v217_v43 = vunpack.c.h.b16 %v27_v39 }
  0x23   :  { %777 = vmatpush.bf16.msrb.mxu1 %v1239_v41  ;;  %731 = vmatmul.bf16.vlgmr.msra.gmra.mxu2 %v870_v44  ;;  %v215_v41 = vunpack.c.h.b16 %v26_v37  ;;  %v1259_v44 = vld [vmem:[%s1590_s1 + $0x218] sm:$0xff] }
  0x24   :  { %749 = vmatmul.bf16.vlgmr.msra.gmra.mxu3 %v874_v45  ;;  %795 = vmatpush.bf16.msrb.mxu2 %v1247_v46  ;;  %v232_v45 = vpack.c.b16 %v214_v40, %v214_v40 }
  0x25   :  { %813 = vmatpush.bf16.msrb.mxu3 %v1255_v47  ;;  %v233_v46 = vpack.c.b16 %v215_v41, %v215_v41  ;;  %v234_v47 = vpack.c.b16 %v216_v42, %v216_v42 }
  0x26   :  { %760 = vmatpush.bf16.msrb.mxu0 %v1230_v48  ;;  %v235_v48 = vpack.c.b16 %v217_v43, %v217_v43 }
  0x27   :  { %778 = vmatpush.bf16.msrb.mxu1 %v1238_v49  ;;  %v1258_v49 = vld [vmem:[%s1590_s1 + $0x210] sm:$0xff] }
  0x28   :  { %796 = vmatpush.bf16.msrb.mxu2 %v1246_v50  ;;  %v1257_v50 = vld [vmem:[%s1590_s1 + $0x208] sm:$0xff] }
  0x29   :  { %814 = vmatpush.bf16.msrb.mxu3 %v1254_v51  ;;  %v28_v51 = vld [vmem:[%s1592_s0 + $0x68] sm:$0xf] }
  0x2a   :  { %761 = vmatpush.bf16.msrb.mxu0 %v1229_v52  ;;  %v1256_v52 = vld [vmem:[%s1590_s1 + $0x200] sm:$0xff] }
  0x2b   :  { %779 = vmatpush.bf16.msrb.mxu1 %v1237_v53  ;;  %v218_v53 = vunpack.c.l.b16 %v28_v51 }
  0x2c   :  { %797 = vmatpush.bf16.msrb.mxu2 %v1245_v55  ;;  %v1191_v55 = vld [vmem:[%s1592_s0 + $0x40] sm:$0xf0] }
  0x2d   :  { %815 = vmatpush.bf16.msrb.mxu3 %v1253_v56  ;;  %v894_v56 = vor.u32 %v1191_v55, %v893_v54  ;;  %v236_v57 = vpack.c.b16 %v218_v53, %v218_v53 }
  0x2e   :  { %762 = vmatpush.bf16.msrb.mxu0 %v1228_v58 }
  0x2f   :  { %780 = vmatpush.bf16.msrb.mxu1 %v1236_v59 }
  0x30   :  { %798 = vmatpush.bf16.msrb.mxu2 %v1244_v0 }
  0x31   :  { %816 = vmatpush.bf16.msrb.mxu3 %v1252_v1  ;;  %700 = vmatmul.bf16.gmra.mxu0 %v228_v4 }
  0x32   :  { %763 = vmatpush.bf16.msrb.mxu0 %v1227_v2  ;;  %718 = vmatmul.bf16.gmra.mxu1 %v229_v5 }
  0x33   :  { %781 = vmatpush.bf16.msrb.mxu1 %v1235_v3  ;;  %736 = vmatmul.bf16.gmra.mxu2 %v230_v6 }
  0x34   :  { %754 = vmatmul.bf16.gmra.mxu3 %v231_v7  ;;  %799 = vmatpush.bf16.msrb.mxu2 %v1243_v8 }
  0x35   :  { %817 = vmatpush.bf16.msrb.mxu3 %v1251_v9 }
  0x36   :  { %764 = vmatpush.bf16.msrb.mxu0 %v1226_v10 }
  0x37   :  { %782 = vmatpush.bf16.msrb.mxu1 %v1234_v11 }
  0x38   :  { %800 = vmatpush.bf16.msrb.mxu2 %v1242_v12  ;;  %v1272_v12 = vld [vmem:[%s1591_s2] ss:$0 sm:$0xff] }
  0x39   :  { %818 = vmatpush.bf16.msrb.mxu3 %v1250_v13 }
  0x3a   :  { %765 = vmatpush.bf16.msrb.mxu0 %v1225_v14 }
  0x3b   :  { %783 = vmatpush.bf16.msrb.mxu1 %v1233_v15 }
  0x3c   :  { %801 = vmatpush.bf16.msrb.mxu2 %v1241_v16 }
  0x3d   :  { %819 = vmatpush.bf16.msrb.mxu3 %v1249_v17 }
  0x3e   :  { %766 = vmatpush.bf16.msrb.mxu0 %v1224_v18 }
  0x3f   :  { %784 = vmatpush.bf16.msrb.mxu1 %v1232_v19 }
  0x40   :  { %802 = vmatpush.bf16.msrb.mxu2 %v1240_v20 }
  0x41   :  { %820 = vmatpush.bf16.msrb.mxu3 %v1248_v21  ;;  %767 = vmatmul.bf16.vlgmr.msrb.gmra.mxu0 %v878_v31 }
  0x42   :  { %831 = vmatpush.bf16.msra.mxu0 %v1263_v24  ;;  %785 = vmatmul.bf16.vlgmr.msrb.gmra.mxu1 %v882_v32 }
  0x43   :  { %1264 = vmatpush.bf16.msra.mxu1 %v1263_v24  ;;  %803 = vmatmul.bf16.vlgmr.msrb.gmra.mxu2 %v886_v33 }
  0x44   :  { %821 = vmatmul.bf16.vlgmr.msrb.gmra.mxu3 %v890_v34 }
  0x46   :  { %832 = vmatpush.bf16.msra.mxu0 %v1262_v35 }
  0x47   :  { %1265 = vmatpush.bf16.msra.mxu1 %v1262_v35 }
  0x4a   :  { %833 = vmatpush.bf16.msra.mxu0 %v1261_v36 }
  0x4b   :  { %1266 = vmatpush.bf16.msra.mxu1 %v1261_v36 }
  0x4e   :  { %834 = vmatpush.bf16.msra.mxu0 %v1260_v38 }
  0x4f   :  { %1267 = vmatpush.bf16.msra.mxu1 %v1260_v38 }
  0x51   :  { %772 = vmatmul.bf16.gmra.mxu0 %v232_v45 }
  0x52   :  { %835 = vmatpush.bf16.msra.mxu0 %v1259_v44  ;;  %790 = vmatmul.bf16.gmra.mxu1 %v233_v46 }
  0x53   :  { %1268 = vmatpush.bf16.msra.mxu1 %v1259_v44  ;;  %808 = vmatmul.bf16.gmra.mxu2 %v234_v47 }
  0x54   :  { %826 = vmatmul.bf16.gmra.mxu3 %v235_v48 }
  0x56   :  { %836 = vmatpush.bf16.msra.mxu0 %v1258_v49 }
  0x57   :  { %1269 = vmatpush.bf16.msra.mxu1 %v1258_v49 }
  0x5a   :  { %837 = vmatpush.bf16.msra.mxu0 %v1257_v50 }
  0x5b   :  { %1270 = vmatpush.bf16.msra.mxu1 %v1257_v50 }
  0x5e   :  { %838 = vmatpush.bf16.msra.mxu0 %v1256_v52 }
  0x5f   :  { %1271 = vmatpush.bf16.msra.mxu1 %v1256_v52 }
  0x61   :  { %839 = vmatmul.bf16.vlgmr.msra.gmra.mxu0 %v894_v56 }
  0x62   :  { %844 = vmatmul.bf16.vlgmr.msra.gmra.mxu1 %v236_v57 }
  0x9e   :  { %v696_v58 = vpop.f32.mrf.mxu0 }
  0x9f   :  { %v714_v59 = vpop.f32.mrf.mxu1  ;;  %v697_v17 = vadd.f32 %v1272_v12, %v696_v58 }
  0xa1   :  { %v715_v19 = vadd.f32 %v714_v59, %v697_v17 }
  0xa6   :  { %v732_v60 = vpop.f32.mrf.mxu2  ;;  %v698_v62 = vpop.f32.mrf.mxu0 }
  0xa7   :  { %v750_v61 = vpop.f32.mrf.mxu3  ;;  %v716_v63 = vpop.f32.mrf.mxu1  ;;  %v733_v21 = vadd.f32 %v732_v60, %v715_v19  ;;  %v699_v27 = vadd.f32 %v1272_v12, %v698_v62 }
  0xa9   :  { %v751_v28 = vadd.f32 %v750_v61, %v733_v21  ;;  %v717_v30 = vadd.f32 %v716_v63, %v699_v27 }
  0xae   :  { %v734_v0 = vpop.f32.mrf.mxu2  ;;  %v701_v2 = vpop.f32.mrf.mxu0 }
  0xaf   :  { %v752_v1 = vpop.f32.mrf.mxu3  ;;  %v719_v3 = vpop.f32.mrf.mxu1  ;;  %v702_v18 = vadd.f32 %v1272_v12, %v701_v2  ;;  %v735_v33 = vadd.f32 %v734_v0, %v717_v30 }
  0xb1   :  { %v720_v20 = vadd.f32 %v719_v3, %v702_v18  ;;  %v753_v40 = vadd.f32 %v752_v1, %v735_v33 }
  0xb6   :  { %v737_v4 = vpop.f32.mrf.mxu2  ;;  %v703_v6 = vpop.f32.mrf.mxu0 }
  0xb7   :  { %v755_v5 = vpop.f32.mrf.mxu3  ;;  %v721_v7 = vpop.f32.mrf.mxu1  ;;  %v738_v22 = vadd.f32 %v737_v4, %v720_v20 }
  0xb9   :  { %v756_v29 = vadd.f32 %v755_v5, %v738_v22 }
  0xbe   :  { %v739_v8 = vpop.f32.mrf.mxu2  ;;  %v768_v10 = vpop.f32.mrf.mxu0 }
  0xbf   :  { %v757_v9 = vpop.f32.mrf.mxu3  ;;  %v786_v11 = vpop.f32.mrf.mxu1  ;;  %v769_v31 = vadd.f32 %v768_v10, %v751_v28 }
  0xc1   :  { %v787_v38 = vadd.f32 %v786_v11, %v769_v31 }
  0xc6   :  { %v804_v13 = vpop.f32.mrf.mxu2  ;;  %v770_v15 = vpop.f32.mrf.mxu0 }
  0xc7   :  { %v822_v14 = vpop.f32.mrf.mxu3  ;;  %v788_v16 = vpop.f32.mrf.mxu1  ;;  %v805_v41 = vadd.f32 %v804_v13, %v787_v38  ;;  %v771_v43 = vadd.f32 %v770_v15, %v753_v40 }
  0xc9   :  { %v823_v44 = vadd.f32 %v822_v14, %v805_v41  ;;  %v789_v50 = vadd.f32 %v788_v16, %v771_v43 }
  0xce   :  { %v806_v23 = vpop.f32.mrf.mxu2  ;;  %v773_v25 = vpop.f32.mrf.mxu0 }
  0xcf   :  { %v824_v24 = vpop.f32.mrf.mxu3  ;;  %v791_v26 = vpop.f32.mrf.mxu1  ;;  %v774_v32 = vadd.f32 %v773_v25, %v756_v29  ;;  %v807_v53 = vadd.f32 %v806_v23, %v789_v50 }
  0xd1   :  { %v792_v39 = vadd.f32 %v791_v26, %v774_v32  ;;  %v825_v56 = vadd.f32 %v824_v24, %v807_v53 }
  0xd6   :  { %v809_v34 = vpop.f32.mrf.mxu2  ;;  %v775_v36 = vpop.f32.mrf.mxu0 }
  0xd7   :  { %v827_v35 = vpop.f32.mrf.mxu3  ;;  %v793_v37 = vpop.f32.mrf.mxu1  ;;  %v810_v42 = vadd.f32 %v809_v34, %v792_v39 }
  0xd9   :  { %v828_v45 = vadd.f32 %v827_v35, %v810_v42 }
  0xde   :  { %v811_v46 = vpop.f32.mrf.mxu2  ;;  %v840_v48 = vpop.f32.mrf.mxu0 }
  0xdf   :  { %v829_v47 = vpop.f32.mrf.mxu3  ;;  %v845_v49 = vpop.f32.mrf.mxu1  ;;  %v841_v51 = vadd.f32 %v840_v48, %v823_v44 }
  0xe0   :  { %v846_v52 = vadd.f32 %v845_v49, %v828_v45 }
  0xe1   :  { %v849_v54 = vmax.f32 %v841_v51, 0.0 }
  0xe2   :  { %v851_v55 = vmax.f32 %v846_v52, 0.0 }
  0xe3   :  { %852 = vst [vmem:[%s1593_s3] sm:$0xff] %v849_v54 }
  0xe4   :  { %854 = vst [vmem:[%s1593_s3 + $0x10] sm:$0xff] %v851_v55 }
  0xe6   :  { %v842_v57 = vpop.f32.mrf.mxu0 }
  0xe7   :  { %v847_v58 = vpop.f32.mrf.mxu1  ;;  %v843_v59 = vadd.f32 %v842_v57, %v825_v56 }
  0xe9   :  { %v850_v60 = vmax.f32 %v843_v59, 0.0 }
  0xeb   :  { %853 = vst [vmem:[%s1593_s3 + $0x8] sm:$0xff] %v850_v60 }

// kernel: a_call__.4
= control target key start
LH: loop header
LB: loop body
LE: loop exit
PB: predicated region body
PF: predicated region fallthrough
CT: control target
= control target key end

     0   :  { %s3562_s1 = inlined_call_operand.vmem [shape: bf16[2048,128], index: 1, kind: input, shape index: {}]   ;;  %s3563_s2 = inlined_call_operand.vmem [shape: f32[1,128], index: 2, kind: input, shape index: {}]   ;;  %s3564_s0 = inlined_call_operand.vmem [shape: bf16[56,2048], index: 0, kind: input, shape index: {}]   ;;  %s3565_s3 = inlined_call_operand.vmem [shape: f32[56,128], index: 3, kind: output, shape index: {}]  }
   0x1   :  { %v2619_v0 = vld [vmem:[%s3562_s1 + $0x38] sm:$0xff]  ;;  %v2618_v4 = vld [vmem:[%s3562_s1 + $0x30] sm:$0xff]  ;;  %v2617_v8 = vld [vmem:[%s3562_s1 + $0x28] sm:$0xff] }
   0x2   :  { %v2627_v1 = vld [vmem:[%s3562_s1 + $0x78] sm:$0xff]  ;;  %1394 = vmatpush.bf16.msra.mxu0 %v2619_v0  ;;  %v2626_v5 = vld [vmem:[%s3562_s1 + $0x70] sm:$0xff]  ;;  %v2625_v9 = vld [vmem:[%s3562_s1 + $0x68] sm:$0xff] }
   0x3   :  { %v2635_v2 = vld [vmem:[%s3562_s1 + $0xb8] sm:$0xff]  ;;  %1422 = vmatpush.bf16.msra.mxu1 %v2627_v1  ;;  %v2634_v6 = vld [vmem:[%s3562_s1 + $0xb0] sm:$0xff]  ;;  %v2633_v10 = vld [vmem:[%s3562_s1 + $0xa8] sm:$0xff] }
   0x4   :  { %v2643_v3 = vld [vmem:[%s3562_s1 + $0xf8] sm:$0xff]  ;;  %1450 = vmatpush.bf16.msra.mxu2 %v2635_v2  ;;  %v2642_v7 = vld [vmem:[%s3562_s1 + $0xf0] sm:$0xff]  ;;  %v2641_v11 = vld [vmem:[%s3562_s1 + $0xe8] sm:$0xff] }
   0x5   :  { %1478 = vmatpush.bf16.msra.mxu3 %v2643_v3  ;;  %v2616_v12 = vld [vmem:[%s3562_s1 + $0x20] sm:$0xff]  ;;  %v2615_v16 = vld [vmem:[%s3562_s1 + $0x18] sm:$0xff]  ;;  %v2614_v20 = vld [vmem:[%s3562_s1 + $0x10] sm:$0xff] }
   0x6   :  { %1395 = vmatpush.bf16.msra.mxu0 %v2618_v4  ;;  %v2624_v13 = vld [vmem:[%s3562_s1 + $0x60] sm:$0xff]  ;;  %v2623_v17 = vld [vmem:[%s3562_s1 + $0x58] sm:$0xff]  ;;  %v2622_v21 = vld [vmem:[%s3562_s1 + $0x50] sm:$0xff] }
   0x7   :  { %1423 = vmatpush.bf16.msra.mxu1 %v2626_v5  ;;  %v2632_v14 = vld [vmem:[%s3562_s1 + $0xa0] sm:$0xff]  ;;  %v2631_v18 = vld [vmem:[%s3562_s1 + $0x98] sm:$0xff]  ;;  %v2630_v22 = vld [vmem:[%s3562_s1 + $0x90] sm:$0xff] }
   0x8   :  { %1451 = vmatpush.bf16.msra.mxu2 %v2634_v6  ;;  %v2640_v15 = vld [vmem:[%s3562_s1 + $0xe0] sm:$0xff]  ;;  %v2639_v19 = vld [vmem:[%s3562_s1 + $0xd8] sm:$0xff]  ;;  %v2638_v23 = vld [vmem:[%s3562_s1 + $0xd0] sm:$0xff] }
   0x9   :  { %1479 = vmatpush.bf16.msra.mxu3 %v2642_v7  ;;  %v2613_v24 = vld [vmem:[%s3562_s1 + $0x8] sm:$0xff]  ;;  %v2612_v28 = vld [vmem:[%s3562_s1] sm:$0xff]  ;;  %v2667_v40 = vld [vmem:[%s3562_s1 + $0x1b8] sm:$0xff] }
   0xa   :  { %1396 = vmatpush.bf16.msra.mxu0 %v2617_v8  ;;  %v2621_v25 = vld [vmem:[%s3562_s1 + $0x48] sm:$0xff]  ;;  %v2620_v29 = vld [vmem:[%s3562_s1 + $0x40] sm:$0xff]  ;;  %v2675_v41 = vld [vmem:[%s3562_s1 + $0x1f8] sm:$0xff] }
   0xb   :  { %1424 = vmatpush.bf16.msra.mxu1 %v2625_v9  ;;  %v2629_v26 = vld [vmem:[%s3562_s1 + $0x88] sm:$0xff]  ;;  %v2628_v30 = vld [vmem:[%s3562_s1 + $0x80] sm:$0xff]  ;;  %v2651_v46 = vld [vmem:[%s3562_s1 + $0x138] sm:$0xff] }
   0xc   :  { %1452 = vmatpush.bf16.msra.mxu2 %v2633_v10  ;;  %v2637_v27 = vld [vmem:[%s3562_s1 + $0xc8] sm:$0xff]  ;;  %v2636_v31 = vld [vmem:[%s3562_s1 + $0xc0] sm:$0xff]  ;;  %v2659_v47 = vld [vmem:[%s3562_s1 + $0x178] sm:$0xff] }
   0xd   :  { %1480 = vmatpush.bf16.msra.mxu3 %v2641_v11  ;;  %v1862_v32 = vld [vmem:[%s3564_s0] sm:$0xf]  ;;  %v2564_v34 = vld [vmem:[%s3564_s0 + $0x4] sm:$0xf]  ;;  %v1870_v36 = vld [vmem:[%s3564_s0 + $0x8] sm:$0xf] }
   0xe   :  { %1397 = vmatpush.bf16.msra.mxu0 %v2616_v12  ;;  %v2572_v33 = vld [vmem:[%s3564_s0 + $0x3c] sm:$0xf0]  ;;  %v1864_v35 = vld [vmem:[%s3564_s0 + $0x40] sm:$0xf0]  ;;  %v2573_v37 = vld [vmem:[%s3564_s0 + $0x44] sm:$0xf0] }
   0xf   :  { %1425 = vmatpush.bf16.msra.mxu1 %v2624_v13  ;;  %v2565_v38 = vld [vmem:[%s3564_s0 + $0xc] sm:$0xf]  ;;  %v1863_v42 = vor.u32 %v2572_v33, %v1862_v32  ;;  %v1867_v43 = vor.u32 %v2564_v34, %v1864_v35  ;;  %v1871_v44 = vor.u32 %v2573_v37, %v1870_v36  ;;  %v2666_v48 = vld [vmem:[%s3562_s1 + $0x1b0] sm:$0xff]  ;;  %v1926_v56 = vld [vmem:[%s3564_s0 + $0x80] sm:$0xf] }
  0x10   :  { %1453 = vmatpush.bf16.msra.mxu2 %v2632_v14  ;;  %v1872_v39 = vld [vmem:[%s3564_s0 + $0x48] sm:$0xf0]  ;;  %v2674_v49 = vld [vmem:[%s3562_s1 + $0x1f0] sm:$0xff]  ;;  %v2664_v57 = vld [vmem:[%s3562_s1 + $0x1a0] sm:$0xff] }
  0x11   :  { %1481 = vmatpush.bf16.msra.mxu3 %v2640_v15  ;;  %v1875_v45 = vor.u32 %v2565_v38, %v1872_v39  ;;  %v2650_v50 = vld [vmem:[%s3562_s1 + $0x130] sm:$0xff]  ;;  %v2665_v52 = vld [vmem:[%s3562_s1 + $0x1a8] sm:$0xff]  ;;  %v2672_v58 = vld [vmem:[%s3562_s1 + $0x1e0] sm:$0xff] }
  0x12   :  { %1398 = vmatpush.bf16.msra.mxu0 %v2615_v16  ;;  %v2658_v51 = vld [vmem:[%s3562_s1 + $0x170] sm:$0xff]  ;;  %v2673_v53 = vld [vmem:[%s3562_s1 + $0x1e8] sm:$0xff]  ;;  %v2588_v59 = vld [vmem:[%s3564_s0 + $0xbc] sm:$0xf0] }
  0x13   :  { %1426 = vmatpush.bf16.msra.mxu1 %v2623_v17  ;;  %v2649_v54 = vld [vmem:[%s3562_s1 + $0x128] sm:$0xff]  ;;  %v2580_v60 = vld [vmem:[%s3564_s0 + $0x84] sm:$0xf]  ;;  %v2663_v4 = vld [vmem:[%s3562_s1 + $0x198] sm:$0xff]  ;;  %v1927_v6 = vor.u32 %v2588_v59, %v1926_v56 }
  0x14   :  { %1454 = vmatpush.bf16.msra.mxu2 %v2631_v18  ;;  %v2657_v55 = vld [vmem:[%s3562_s1 + $0x168] sm:$0xff]  ;;  %v1928_v61 = vld [vmem:[%s3564_s0 + $0xc0] sm:$0xf0]  ;;  %v2671_v5 = vld [vmem:[%s3562_s1 + $0x1d8] sm:$0xff] }
  0x15   :  { %1482 = vmatpush.bf16.msra.mxu3 %v2639_v19  ;;  %v1934_v62 = vld [vmem:[%s3564_s0 + $0x88] sm:$0xf]  ;;  %v2581_v0 = vld [vmem:[%s3564_s0 + $0x8c] sm:$0xf]  ;;  %v2648_v2 = vld [vmem:[%s3562_s1 + $0x120] sm:$0xff]  ;;  %v1931_v7 = vor.u32 %v2580_v60, %v1928_v61 }
  0x16   :  { %1399 = vmatpush.bf16.msra.mxu0 %v2614_v20  ;;  %v2589_v63 = vld [vmem:[%s3564_s0 + $0xc4] sm:$0xf0]  ;;  %v1936_v1 = vld [vmem:[%s3564_s0 + $0xc8] sm:$0xf0]  ;;  %v2656_v3 = vld [vmem:[%s3562_s1 + $0x160] sm:$0xff] }
  0x17   :  { %1427 = vmatpush.bf16.msra.mxu1 %v2622_v21  ;;  %v1935_v8 = vor.u32 %v2589_v63, %v1934_v62  ;;  %v1939_v9 = vor.u32 %v2581_v0, %v1936_v1  ;;  %v2647_v10 = vld [vmem:[%s3562_s1 + $0x118] sm:$0xff]  ;;  %v2662_v12 = vld [vmem:[%s3562_s1 + $0x190] sm:$0xff]  ;;  %v2661_v16 = vld [vmem:[%s3562_s1 + $0x188] sm:$0xff] }
  0x18   :  { %1455 = vmatpush.bf16.msra.mxu2 %v2630_v22  ;;  %v2655_v11 = vld [vmem:[%s3562_s1 + $0x158] sm:$0xff]  ;;  %v2670_v13 = vld [vmem:[%s3562_s1 + $0x1d0] sm:$0xff]  ;;  %v2669_v17 = vld [vmem:[%s3562_s1 + $0x1c8] sm:$0xff] }
  0x19   :  { %1483 = vmatpush.bf16.msra.mxu3 %v2638_v23  ;;  %v2646_v14 = vld [vmem:[%s3562_s1 + $0x110] sm:$0xff]  ;;  %v2645_v18 = vld [vmem:[%s3562_s1 + $0x108] sm:$0xff]  ;;  %v1990_v20 = vld [vmem:[%s3564_s0 + $0x100] sm:$0xf] }
  0x1a   :  { %1400 = vmatpush.bf16.msra.mxu0 %v2613_v24  ;;  %v2654_v15 = vld [vmem:[%s3562_s1 + $0x150] sm:$0xff]  ;;  %v2653_v19 = vld [vmem:[%s3562_s1 + $0x148] sm:$0xff]  ;;  %v2660_v21 = vld [vmem:[%s3562_s1 + $0x180] sm:$0xff] }
  0x1b   :  { %1428 = vmatpush.bf16.msra.mxu1 %v2621_v25  ;;  %v2668_v22 = vld [vmem:[%s3562_s1 + $0x1c0] sm:$0xff]  ;;  %v2699_v36 = vld [vmem:[%s3562_s1 + $0x2b8] sm:$0xff]  ;;  %v2681_v56 = vld [vmem:[%s3562_s1 + $0x228] sm:$0xff] }
  0x1c   :  { %1456 = vmatpush.bf16.msra.mxu2 %v2629_v26  ;;  %v2604_v23 = vld [vmem:[%s3564_s0 + $0x13c] sm:$0xf0]  ;;  %v2596_v24 = vld [vmem:[%s3564_s0 + $0x104] sm:$0xf]  ;;  %v1998_v26 = vld [vmem:[%s3564_s0 + $0x108] sm:$0xf] }
  0x1d   :  { %1484 = vmatpush.bf16.msra.mxu3 %v2637_v27  ;;  %v1992_v25 = vld [vmem:[%s3564_s0 + $0x140] sm:$0xf0]  ;;  %v2605_v27 = vld [vmem:[%s3564_s0 + $0x144] sm:$0xf0]  ;;  %v1991_v32 = vor.u32 %v2604_v23, %v1990_v20  ;;  %v2707_v37 = vld [vmem:[%s3562_s1 + $0x2f8] sm:$0xff] }
  0x1e   :  { %1401 = vmatpush.bf16.msra.mxu0 %v2612_v28  ;;  %v2597_v28 = vld [vmem:[%s3564_s0 + $0x10c] sm:$0xf]  ;;  %v1995_v33 = vor.u32 %v2596_v24, %v1992_v25  ;;  %v1999_v34 = vor.u32 %v2605_v27, %v1998_v26  ;;  %v2683_v38 = vld [vmem:[%s3562_s1 + $0x238] sm:$0xff]  ;;  %v2704_v59 = vld [vmem:[%s3562_s1 + $0x2e0] sm:$0xff] }
  0x1f   :  { %1429 = vmatpush.bf16.msra.mxu1 %v2620_v29  ;;  %v2000_v29 = vld [vmem:[%s3564_s0 + $0x148] sm:$0xf0]  ;;  %v2691_v39 = vld [vmem:[%s3562_s1 + $0x278] sm:$0xff]  ;;  %v2680_v60 = vld [vmem:[%s3562_s1 + $0x220] sm:$0xff] }
  0x20   :  { %1457 = vmatpush.bf16.msra.mxu2 %v2628_v30  ;;  %v2644_v30 = vld [vmem:[%s3562_s1 + $0x100] sm:$0xff]  ;;  %v2003_v35 = vor.u32 %v2597_v28, %v2000_v29  ;;  %v1878_v62 = vld [vmem:[%s3564_s0 + $0x10] sm:$0xf]  ;;  %v2566_v0 = vld [vmem:[%s3564_s0 + $0x14] sm:$0xf] }
  0x21   :  { %1485 = vmatpush.bf16.msra.mxu3 %v2636_v31  ;;  %1402 = vmatmul.bf16.vlgmr.msra.gmra.mxu0 %v1863_v42  ;;  %v2652_v31 = vld [vmem:[%s3562_s1 + $0x140] sm:$0xff]  ;;  %v2682_v42 = vld [vmem:[%s3562_s1 + $0x230] sm:$0xff]  ;;  %v2591_v23 = vld [vmem:[%s3564_s0 + $0xd4] sm:$0xf0] }
  0x22   :  { %1430 = vmatmul.bf16.vlgmr.msra.gmra.mxu1 %v1867_v43  ;;  %1506 = vmatpush.bf16.msrb.mxu0 %v2651_v46  ;;  %v2690_v43 = vld [vmem:[%s3562_s1 + $0x270] sm:$0xff]  ;;  %v2688_v61 = vld [vmem:[%s3562_s1 + $0x260] sm:$0xff]  ;;  %v2583_v24 = vld [vmem:[%s3564_s0 + $0x9c] sm:$0xf] }
  0x23   :  { %1458 = vmatmul.bf16.vlgmr.msra.gmra.mxu2 %v1871_v44  ;;  %1534 = vmatpush.bf16.msrb.mxu1 %v2659_v47  ;;  %v62_v44 = vld [vmem:[%s3564_s0 + $0x180] sm:$0xff]  ;;  %v2574_v63 = vld [vmem:[%s3564_s0 + $0x4c] sm:$0xf0]  ;;  %v1880_v1 = vld [vmem:[%s3564_s0 + $0x50] sm:$0xf0] }
  0x24   :  { %1562 = vmatpush.bf16.msrb.mxu2 %v2667_v40  ;;  %1486 = vmatmul.bf16.vlgmr.msra.gmra.mxu3 %v1875_v45  ;;  %v2698_v40 = vld [vmem:[%s3562_s1 + $0x2b0] sm:$0xff]  ;;  %v63_v45 = vld [vmem:[%s3564_s0 + $0x188] sm:$0xff]  ;;  %v482_v46 = vunpack.c.l.b16 %v62_v44  ;;  %v483_v47 = vunpack.c.h.b16 %v62_v44  ;;  %v1952_v25 = vld [vmem:[%s3564_s0 + $0xd8] sm:$0xf0] }
  0x25   :  { %1590 = vmatpush.bf16.msrb.mxu3 %v2675_v41  ;;  %v2706_v41 = vld [vmem:[%s3562_s1 + $0x2f0] sm:$0xff]  ;;  %v1955_v29 = vor.u32 %v2583_v24, %v1952_v25  ;;  %v2016_v44 = vld [vmem:[%s3564_s0 + $0x158] sm:$0xf0] }
  0x26   :  { %1507 = vmatpush.bf16.msrb.mxu0 %v2650_v50  ;;  %v546_v50 = vpack.c.b16 %v482_v46, %v482_v46  ;;  %v2582_v20 = vld [vmem:[%s3564_s0 + $0x94] sm:$0xf] }
  0x27   :  { %1535 = vmatpush.bf16.msrb.mxu1 %v2658_v51  ;;  %v547_v51 = vpack.c.b16 %v483_v47, %v483_v47  ;;  %v2684_v47 = vld [vmem:[%s3562_s1 + $0x240] sm:$0xff] }
  0x28   :  { %1563 = vmatpush.bf16.msrb.mxu2 %v2666_v48  ;;  %v484_v48 = vunpack.c.l.b16 %v63_v45 }
  0x29   :  { %1591 = vmatpush.bf16.msrb.mxu3 %v2674_v49  ;;  %v485_v49 = vunpack.c.h.b16 %v63_v45 }
  0x2a   :  { %1508 = vmatpush.bf16.msrb.mxu0 %v2649_v54  ;;  %v2697_v54 = vld [vmem:[%s3562_s1 + $0x2a8] sm:$0xff] }
  0x2b   :  { %1536 = vmatpush.bf16.msrb.mxu1 %v2657_v55  ;;  %v2705_v55 = vld [vmem:[%s3562_s1 + $0x2e8] sm:$0xff] }
  0x2c   :  { %1564 = vmatpush.bf16.msrb.mxu2 %v2665_v52  ;;  %v548_v52 = vpack.c.b16 %v484_v48, %v484_v48 }
  0x2d   :  { %1592 = vmatpush.bf16.msrb.mxu3 %v2673_v53  ;;  %v549_v53 = vpack.c.b16 %v485_v49, %v485_v49 }
  0x2e   :  { %1509 = vmatpush.bf16.msrb.mxu0 %v2648_v2  ;;  %v1886_v2 = vld [vmem:[%s3564_s0 + $0x18] sm:$0xf] }
  0x2f   :  { %1537 = vmatpush.bf16.msrb.mxu1 %v2656_v3  ;;  %v2575_v3 = vld [vmem:[%s3564_s0 + $0x54] sm:$0xf0] }
  0x30   :  { %1565 = vmatpush.bf16.msrb.mxu2 %v2664_v57  ;;  %v2689_v57 = vld [vmem:[%s3562_s1 + $0x268] sm:$0xff] }
  0x31   :  { %1593 = vmatpush.bf16.msrb.mxu3 %v2672_v58  ;;  %1407 = vmatmul.bf16.gmra.mxu0 %v1927_v6  ;;  %v2696_v58 = vld [vmem:[%s3562_s1 + $0x2a0] sm:$0xff]  ;;  %v1879_v6 = vor.u32 %v2574_v63, %v1878_v62 }
  0x32   :  { %1435 = vmatmul.bf16.gmra.mxu1 %v1931_v7  ;;  %1510 = vmatpush.bf16.msrb.mxu0 %v2647_v10  ;;  %v1883_v7 = vor.u32 %v2566_v0, %v1880_v1  ;;  %v2695_v10 = vld [vmem:[%s3562_s1 + $0x298] sm:$0xff] }
  0x33   :  { %1463 = vmatmul.bf16.gmra.mxu2 %v1935_v8  ;;  %1538 = vmatpush.bf16.msrb.mxu1 %v2655_v11  ;;  %v1887_v8 = vor.u32 %v2575_v3, %v1886_v2  ;;  %v2703_v11 = vld [vmem:[%s3562_s1 + $0x2d8] sm:$0xff]  ;;  %v2714_v2 = vld [vmem:[%s3562_s1 + $0x330] sm:$0xff] }
  0x34   :  { %1566 = vmatpush.bf16.msrb.mxu2 %v2663_v4  ;;  %1491 = vmatmul.bf16.gmra.mxu3 %v1939_v9  ;;  %v2567_v4 = vld [vmem:[%s3564_s0 + $0x1c] sm:$0xf]  ;;  %v2722_v3 = vld [vmem:[%s3562_s1 + $0x370] sm:$0xff] }
  0x35   :  { %1594 = vmatpush.bf16.msrb.mxu3 %v2671_v5  ;;  %v1888_v5 = vld [vmem:[%s3564_s0 + $0x58] sm:$0xf0] }
  0x36   :  { %1511 = vmatpush.bf16.msrb.mxu0 %v2646_v14  ;;  %v1891_v9 = vor.u32 %v2567_v4, %v1888_v5  ;;  %v2694_v14 = vld [vmem:[%s3562_s1 + $0x290] sm:$0xff]  ;;  %v2729_v4 = vld [vmem:[%s3562_s1 + $0x3a8] sm:$0xff] }
  0x37   :  { %1539 = vmatpush.bf16.msrb.mxu1 %v2654_v15  ;;  %v2702_v15 = vld [vmem:[%s3562_s1 + $0x2d0] sm:$0xff]  ;;  %v2737_v5 = vld [vmem:[%s3562_s1 + $0x3e8] sm:$0xff] }
  0x38   :  { %1567 = vmatpush.bf16.msrb.mxu2 %v2662_v12  ;;  %v2679_v12 = vld [vmem:[%s3562_s1 + $0x218] sm:$0xff] }
  0x39   :  { %1595 = vmatpush.bf16.msrb.mxu3 %v2670_v13  ;;  %v2687_v13 = vld [vmem:[%s3562_s1 + $0x258] sm:$0xff] }
  0x3a   :  { %1512 = vmatpush.bf16.msrb.mxu0 %v2645_v18  ;;  %v1942_v18 = vld [vmem:[%s3564_s0 + $0x90] sm:$0xf] }
  0x3b   :  { %1540 = vmatpush.bf16.msrb.mxu1 %v2653_v19  ;;  %v2590_v19 = vld [vmem:[%s3564_s0 + $0xcc] sm:$0xf0] }
  0x3c   :  { %1568 = vmatpush.bf16.msrb.mxu2 %v2661_v16  ;;  %v2678_v16 = vld [vmem:[%s3562_s1 + $0x210] sm:$0xff]  ;;  %v1943_v26 = vor.u32 %v2590_v19, %v1942_v18  ;;  %v1904_v18 = vld [vmem:[%s3564_s0 + $0x68] sm:$0xf0] }
  0x3d   :  { %1596 = vmatpush.bf16.msrb.mxu3 %v2669_v17  ;;  %v2686_v17 = vld [vmem:[%s3562_s1 + $0x250] sm:$0xff] }
  0x3e   :  { %1513 = vmatpush.bf16.msrb.mxu0 %v2644_v30  ;;  %v2693_v30 = vld [vmem:[%s3562_s1 + $0x288] sm:$0xff] }
  0x3f   :  { %1541 = vmatpush.bf16.msrb.mxu1 %v2652_v31  ;;  %v2701_v31 = vld [vmem:[%s3562_s1 + $0x2c8] sm:$0xff] }
  0x40   :  { %1569 = vmatpush.bf16.msrb.mxu2 %v2660_v21  ;;  %v1944_v21 = vld [vmem:[%s3564_s0 + $0xd0] sm:$0xf0] }
  0x41   :  { %1597 = vmatpush.bf16.msrb.mxu3 %v2668_v22  ;;  %1412 = vmatmul.bf16.gmra.mxu0 %v1991_v32  ;;  %v1950_v22 = vld [vmem:[%s3564_s0 + $0x98] sm:$0xf]  ;;  %v1947_v27 = vor.u32 %v2582_v20, %v1944_v21  ;;  %v2677_v32 = vld [vmem:[%s3562_s1 + $0x208] sm:$0xff] }
  0x42   :  { %1440 = vmatmul.bf16.gmra.mxu1 %v1995_v33  ;;  %1618 = vmatpush.bf16.msra.mxu0 %v2683_v38  ;;  %v1951_v28 = vor.u32 %v2591_v23, %v1950_v22  ;;  %v2685_v33 = vld [vmem:[%s3562_s1 + $0x248] sm:$0xff]  ;;  %v2606_v38 = vld [vmem:[%s3564_s0 + $0x14c] sm:$0xf0] }
  0x43   :  { %1468 = vmatmul.bf16.gmra.mxu2 %v1999_v34  ;;  %1646 = vmatpush.bf16.msra.mxu1 %v2691_v39  ;;  %v2692_v34 = vld [vmem:[%s3562_s1 + $0x280] sm:$0xff]  ;;  %v2598_v39 = vld [vmem:[%s3564_s0 + $0x114] sm:$0xf] }
  0x44   :  { %1496 = vmatmul.bf16.gmra.mxu3 %v2003_v35  ;;  %1674 = vmatpush.bf16.msra.mxu2 %v2699_v36  ;;  %v2700_v35 = vld [vmem:[%s3562_s1 + $0x2c0] sm:$0xff] }
  0x45   :  { %1702 = vmatpush.bf16.msra.mxu3 %v2707_v37  ;;  %v2676_v36 = vld [vmem:[%s3562_s1 + $0x200] sm:$0xff]  ;;  %v2006_v37 = vld [vmem:[%s3564_s0 + $0x110] sm:$0xf] }
  0x46   :  { %1619 = vmatpush.bf16.msra.mxu0 %v2682_v42  ;;  %v2607_v42 = vld [vmem:[%s3564_s0 + $0x154] sm:$0xf0]  ;;  %v2007_v45 = vor.u32 %v2606_v38, %v2006_v37  ;;  %v1958_v38 = vld [vmem:[%s3564_s0 + $0xa0] sm:$0xf] }
  0x47   :  { %1647 = vmatpush.bf16.msra.mxu1 %v2690_v43  ;;  %v2599_v43 = vld [vmem:[%s3564_s0 + $0x11c] sm:$0xf] }
  0x48   :  { %1675 = vmatpush.bf16.msra.mxu2 %v2698_v40  ;;  %v2008_v40 = vld [vmem:[%s3564_s0 + $0x150] sm:$0xf0]  ;;  %v2019_v49 = vor.u32 %v2599_v43, %v2016_v44 }
  0x49   :  { %1703 = vmatpush.bf16.msra.mxu3 %v2706_v41  ;;  %v2014_v41 = vld [vmem:[%s3564_s0 + $0x118] sm:$0xf]  ;;  %v2011_v46 = vor.u32 %v2598_v39, %v2008_v40  ;;  %v2592_v39 = vld [vmem:[%s3564_s0 + $0xdc] sm:$0xf0]  ;;  %v2726_v43 = vld [vmem:[%s3562_s1 + $0x390] sm:$0xff] }
  0x4a   :  { %1620 = vmatpush.bf16.msra.mxu0 %v2681_v56  ;;  %v2015_v48 = vor.u32 %v2607_v42, %v2014_v41  ;;  %v2711_v40 = vld [vmem:[%s3562_s1 + $0x318] sm:$0xff]  ;;  %v2734_v44 = vld [vmem:[%s3562_s1 + $0x3d0] sm:$0xff] }
  0x4b   :  { %1648 = vmatpush.bf16.msra.mxu1 %v2689_v57  ;;  %v2723_v57 = vld [vmem:[%s3562_s1 + $0x378] sm:$0xff] }
  0x4c   :  { %1676 = vmatpush.bf16.msra.mxu2 %v2697_v54  ;;  %v2715_v54 = vld [vmem:[%s3562_s1 + $0x338] sm:$0xff] }
  0x4d   :  { %1704 = vmatpush.bf16.msra.mxu3 %v2705_v55  ;;  %v2719_v42 = vld [vmem:[%s3562_s1 + $0x358] sm:$0xff] }
  0x4e   :  { %1621 = vmatpush.bf16.msra.mxu0 %v2680_v60 }
  0x4f   :  { %1649 = vmatpush.bf16.msra.mxu1 %v2688_v61 }
  0x50   :  { %1677 = vmatpush.bf16.msra.mxu2 %v2696_v58  ;;  %v2730_v58 = vld [vmem:[%s3562_s1 + $0x3b0] sm:$0xff] }
  0x51   :  { %1417 = vmatmul.bf16.gmra.mxu0 %v546_v50  ;;  %1705 = vmatpush.bf16.msra.mxu3 %v2704_v59  ;;  %v2731_v50 = vld [vmem:[%s3562_s1 + $0x3b8] sm:$0xff]  ;;  %v2738_v59 = vld [vmem:[%s3562_s1 + $0x3f0] sm:$0xff] }
  0x52   :  { %1445 = vmatmul.bf16.gmra.mxu1 %v547_v51  ;;  %1622 = vmatpush.bf16.msra.mxu0 %v2679_v12  ;;  %v2739_v51 = vld [vmem:[%s3562_s1 + $0x3f8] sm:$0xff]  ;;  %v2736_v12 = vld [vmem:[%s3562_s1 + $0x3e0] sm:$0xff] }
  0x53   :  { %1473 = vmatmul.bf16.gmra.mxu2 %v548_v52  ;;  %1650 = vmatpush.bf16.msra.mxu1 %v2687_v13  ;;  %v64_v52 = vld [vmem:[%s3564_s0 + $0x190] sm:$0xff]  ;;  %v2568_v13 = vld [vmem:[%s3564_s0 + $0x24] sm:$0xf] }
  0x54   :  { %1501 = vmatmul.bf16.gmra.mxu3 %v549_v53  ;;  %1678 = vmatpush.bf16.msra.mxu2 %v2695_v10  ;;  %v65_v53 = vld [vmem:[%s3564_s0 + $0x198] sm:$0xff]  ;;  %v486_v55 = vunpack.c.l.b16 %v64_v52  ;;  %v487_v56 = vunpack.c.h.b16 %v64_v52  ;;  %v2721_v10 = vld [vmem:[%s3562_s1 + $0x368] sm:$0xff] }
  0x55   :  { %1706 = vmatpush.bf16.msra.mxu3 %v2703_v11  ;;  %v488_v60 = vunpack.c.l.b16 %v65_v53  ;;  %v489_v61 = vunpack.c.h.b16 %v65_v53  ;;  %v2728_v11 = vld [vmem:[%s3562_s1 + $0x3a0] sm:$0xff]  ;;  %v1959_v53 = vor.u32 %v2592_v39, %v1958_v38 }
  0x56   :  { %1623 = vmatpush.bf16.msra.mxu0 %v2678_v16  ;;  %v550_v62 = vpack.c.b16 %v486_v55, %v486_v55  ;;  %v551_v63 = vpack.c.b16 %v487_v56, %v487_v56  ;;  %v2577_v16 = vld [vmem:[%s3564_s0 + $0x64] sm:$0xf0] }
  0x57   :  { %1651 = vmatpush.bf16.msra.mxu1 %v2686_v17  ;;  %v552_v0 = vpack.c.b16 %v488_v60, %v488_v60  ;;  %v553_v1 = vpack.c.b16 %v489_v61, %v489_v61  ;;  %v2569_v17 = vld [vmem:[%s3564_s0 + $0x2c] sm:$0xf] }
  0x58   :  { %1679 = vmatpush.bf16.msra.mxu2 %v2694_v14  ;;  %v1896_v14 = vld [vmem:[%s3564_s0 + $0x60] sm:$0xf0]  ;;  %v1907_v24 = vor.u32 %v2569_v17, %v1904_v18 }
  0x59   :  { %1707 = vmatpush.bf16.msra.mxu3 %v2702_v15  ;;  %v1902_v15 = vld [vmem:[%s3564_s0 + $0x28] sm:$0xf]  ;;  %v1899_v20 = vor.u32 %v2568_v13, %v1896_v14  ;;  %v2724_v13 = vld [vmem:[%s3562_s1 + $0x380] sm:$0xff] }
  0x5a   :  { %1624 = vmatpush.bf16.msra.mxu0 %v2677_v32  ;;  %v1903_v23 = vor.u32 %v2577_v16, %v1902_v15  ;;  %v2022_v15 = vld [vmem:[%s3564_s0 + $0x120] sm:$0xf]  ;;  %v2600_v18 = vld [vmem:[%s3564_s0 + $0x124] sm:$0xf] }
  0x5b   :  { %1652 = vmatpush.bf16.msra.mxu1 %v2685_v33  ;;  %v2608_v16 = vld [vmem:[%s3564_s0 + $0x15c] sm:$0xf0] }
  0x5c   :  { %1680 = vmatpush.bf16.msra.mxu2 %v2693_v30  ;;  %v2735_v30 = vld [vmem:[%s3562_s1 + $0x3d8] sm:$0xff]  ;;  %v2732_v17 = vld [vmem:[%s3562_s1 + $0x3c0] sm:$0xff] }
  0x5d   :  { %1708 = vmatpush.bf16.msra.mxu3 %v2701_v31 }
  0x5e   :  { %1625 = vmatpush.bf16.msra.mxu0 %v2676_v36 }
  0x5f   :  { %1653 = vmatpush.bf16.msra.mxu1 %v2684_v47  ;;  %v1966_v47 = vld [vmem:[%s3564_s0 + $0xa8] sm:$0xf] }
  0x60   :  { %1681 = vmatpush.bf16.msra.mxu2 %v2692_v34 }
  0x61   :  { %1514 = vmatmul.bf16.vlgmr.msrb.gmra.mxu0 %v1879_v6  ;;  %1709 = vmatpush.bf16.msra.mxu3 %v2700_v35  ;;  %v1894_v6 = vld [vmem:[%s3564_s0 + $0x20] sm:$0xf] }
  0x62   :  { %1542 = vmatmul.bf16.vlgmr.msrb.gmra.mxu1 %v1883_v7  ;;  %1730 = vmatpush.bf16.msrb.mxu0 %v2715_v54  ;;  %v2576_v7 = vld [vmem:[%s3564_s0 + $0x5c] sm:$0xf0] }
  0x63   :  { %1570 = vmatmul.bf16.vlgmr.msrb.gmra.mxu2 %v1887_v8  ;;  %1758 = vmatpush.bf16.msrb.mxu1 %v2723_v57  ;;  %v2713_v8 = vld [vmem:[%s3562_s1 + $0x328] sm:$0xff]  ;;  %v1895_v19 = vor.u32 %v2576_v7, %v1894_v6 }
  0x64   :  { %1598 = vmatmul.bf16.vlgmr.msrb.gmra.mxu3 %v1891_v9  ;;  %1786 = vmatpush.bf16.msrb.mxu2 %v2731_v50  ;;  %v3247_v9 = vld [vmem:[%s3563_s2] ss:$0 sm:$0xff]  ;;  %v1968_v50 = vld [vmem:[%s3564_s0 + $0xe8] sm:$0xf0] }
  0x65   :  { %1814 = vmatpush.bf16.msrb.mxu3 %v2739_v51 }
  0x66   :  { %1731 = vmatpush.bf16.msrb.mxu0 %v2714_v2  ;;  %v2733_v2 = vld [vmem:[%s3562_s1 + $0x3c8] sm:$0xff] }
  0x67   :  { %1759 = vmatpush.bf16.msrb.mxu1 %v2722_v3 }
  0x68   :  { %1787 = vmatpush.bf16.msrb.mxu2 %v2730_v58 }
  0x69   :  { %1815 = vmatpush.bf16.msrb.mxu3 %v2738_v59 }
  0x6a   :  { %1732 = vmatpush.bf16.msrb.mxu0 %v2713_v8 }
  0x6b   :  { %1760 = vmatpush.bf16.msrb.mxu1 %v2721_v10 }
  0x6c   :  { %1788 = vmatpush.bf16.msrb.mxu2 %v2729_v4 }
  0x6d   :  { %1816 = vmatpush.bf16.msrb.mxu3 %v2737_v5 }
  0x70   :  { %1789 = vmatpush.bf16.msrb.mxu2 %v2728_v11  ;;  %v2709_v11 = vld [vmem:[%s3562_s1 + $0x308] sm:$0xff] }
  0x71   :  { %1519 = vmatmul.bf16.gmra.mxu0 %v1943_v26  ;;  %1817 = vmatpush.bf16.msrb.mxu3 %v2736_v12  ;;  %v2712_v26 = vld [vmem:[%s3562_s1 + $0x320] sm:$0xff]  ;;  %v2717_v12 = vld [vmem:[%s3562_s1 + $0x348] sm:$0xff] }
  0x72   :  { %1547 = vmatmul.bf16.gmra.mxu1 %v1947_v27  ;;  %1733 = vmatpush.bf16.msrb.mxu0 %v2712_v26  ;;  %v2023_v26 = vor.u32 %v2608_v16, %v2022_v15  ;;  %v2571_v15 = vld [vmem:[%s3564_s0 + $0x3c] sm:$0xf] }
  0x73   :  { %1575 = vmatmul.bf16.gmra.mxu2 %v1951_v28  ;;  %v2720_v28 = vld [vmem:[%s3562_s1 + $0x360] sm:$0xff]  ;;  %v1920_v16 = vld [vmem:[%s3564_s0 + $0x78] sm:$0xf0] }
  0x74   :  { %1603 = vmatmul.bf16.gmra.mxu3 %v1955_v29  ;;  %v2727_v29 = vld [vmem:[%s3562_s1 + $0x398] sm:$0xff]  ;;  %1761 = vmatpush.bf16.msrb.mxu1 %v2720_v28  ;;  %v2708_v28 = vld [vmem:[%s3562_s1 + $0x300] sm:$0xff] }
  0x75   :  { %1790 = vmatpush.bf16.msrb.mxu2 %v2727_v29  ;;  %1818 = vmatpush.bf16.msrb.mxu3 %v2735_v30  ;;  %v2716_v29 = vld [vmem:[%s3562_s1 + $0x340] sm:$0xff] }
  0x76   :  { %1734 = vmatpush.bf16.msrb.mxu0 %v2711_v40 }
  0x78   :  { %1762 = vmatpush.bf16.msrb.mxu1 %v2719_v42 }
  0x79   :  { %1791 = vmatpush.bf16.msrb.mxu2 %v2726_v43  ;;  %1819 = vmatpush.bf16.msrb.mxu3 %v2734_v44  ;;  %v66_v44 = vld [vmem:[%s3564_s0 + $0x1a0] sm:$0xff] }
  0x7d   :  { %1820 = vmatpush.bf16.msrb.mxu3 %v2733_v2 }
  0x81   :  { %1524 = vmatmul.bf16.gmra.mxu0 %v2007_v45  ;;  %v2584_v45 = vld [vmem:[%s3564_s0 + $0xa4] sm:$0xf]  ;;  %1821 = vmatpush.bf16.msrb.mxu3 %v2732_v17 }
  0x82   :  { %1552 = vmatmul.bf16.gmra.mxu1 %v2011_v46  ;;  %v1960_v46 = vld [vmem:[%s3564_s0 + $0xe0] sm:$0xf0] }
  0x83   :  { %1580 = vmatmul.bf16.gmra.mxu2 %v2015_v48  ;;  %v2593_v48 = vld [vmem:[%s3564_s0 + $0xe4] sm:$0xf0]  ;;  %v1963_v54 = vor.u32 %v2584_v45, %v1960_v46 }
  0x84   :  { %1608 = vmatmul.bf16.gmra.mxu3 %v2019_v49  ;;  %v2585_v49 = vld [vmem:[%s3564_s0 + $0xac] sm:$0xf]  ;;  %v1967_v58 = vor.u32 %v2593_v48, %v1966_v47 }
  0x85   :  { %v1971_v59 = vor.u32 %v2585_v49, %v1968_v50  ;;  %v67_v46 = vld [vmem:[%s3564_s0 + $0x1a8] sm:$0xff]  ;;  %v490_v49 = vunpack.c.l.b16 %v66_v44  ;;  %v491_v50 = vunpack.c.h.b16 %v66_v44 }
  0x91   :  { %1529 = vmatmul.bf16.gmra.mxu0 %v550_v62  ;;  %v2710_v62 = vld [vmem:[%s3562_s1 + $0x310] sm:$0xff] }
  0x92   :  { %1557 = vmatmul.bf16.gmra.mxu1 %v551_v63  ;;  %1735 = vmatpush.bf16.msrb.mxu0 %v2710_v62 }
  0x93   :  { %1585 = vmatmul.bf16.gmra.mxu2 %v552_v0  ;;  %v2718_v0 = vld [vmem:[%s3562_s1 + $0x350] sm:$0xff] }
  0x94   :  { %1613 = vmatmul.bf16.gmra.mxu3 %v553_v1  ;;  %v2725_v1 = vld [vmem:[%s3562_s1 + $0x388] sm:$0xff]  ;;  %1763 = vmatpush.bf16.msrb.mxu1 %v2718_v0 }
  0x95   :  { %1792 = vmatpush.bf16.msrb.mxu2 %v2725_v1 }
  0x96   :  { %1736 = vmatpush.bf16.msrb.mxu0 %v2709_v11  ;;  %v2570_v11 = vld [vmem:[%s3564_s0 + $0x34] sm:$0xf] }
  0x98   :  { %1764 = vmatpush.bf16.msrb.mxu1 %v2717_v12  ;;  %v1912_v12 = vld [vmem:[%s3564_s0 + $0x70] sm:$0xf0] }
  0x99   :  { %1793 = vmatpush.bf16.msrb.mxu2 %v2724_v13  ;;  %v1918_v13 = vld [vmem:[%s3564_s0 + $0x38] sm:$0xf] }
  0x9a   :  { %1737 = vmatpush.bf16.msrb.mxu0 %v2708_v28 }
  0x9c   :  { %1765 = vmatpush.bf16.msrb.mxu1 %v2716_v29 }
  0x9e   :  { %v1403_v21 = vpop.f32.mrf.mxu0 }
  0x9f   :  { %v1431_v22 = vpop.f32.mrf.mxu1  ;;  %v1404_v25 = vadd.f32 %v3247_v9, %v1403_v21  ;;  %v2609_v21 = vld [vmem:[%s3564_s0 + $0x164] sm:$0xf0] }
  0xa1   :  { %v1432_v27 = vadd.f32 %v1431_v22, %v1404_v25  ;;  %1626 = vmatmul.bf16.vlgmr.msra.gmra.mxu0 %v1895_v19  ;;  %v2024_v19 = vld [vmem:[%s3564_s0 + $0x160] sm:$0xf0]  ;;  %v2601_v22 = vld [vmem:[%s3564_s0 + $0x12c] sm:$0xf] }
  0xa2   :  { %1654 = vmatmul.bf16.vlgmr.msra.gmra.mxu1 %v1899_v20  ;;  %v2030_v20 = vld [vmem:[%s3564_s0 + $0x128] sm:$0xf] }
  0xa3   :  { %1682 = vmatmul.bf16.vlgmr.msra.gmra.mxu2 %v1903_v23  ;;  %v2032_v23 = vld [vmem:[%s3564_s0 + $0x168] sm:$0xf0] }
  0xa4   :  { %1710 = vmatmul.bf16.vlgmr.msra.gmra.mxu3 %v1907_v24 }
  0xa6   :  { %v1459_v31 = vpop.f32.mrf.mxu2  ;;  %v1405_v34 = vpop.f32.mrf.mxu0 }
  0xa7   :  { %v1487_v32 = vpop.f32.mrf.mxu3  ;;  %v1460_v33 = vadd.f32 %v1459_v31, %v1432_v27  ;;  %v1433_v35 = vpop.f32.mrf.mxu1  ;;  %v1406_v36 = vadd.f32 %v3247_v9, %v1405_v34  ;;  %v2027_v27 = vor.u32 %v2600_v18, %v2024_v19  ;;  %v2035_v34 = vor.u32 %v2601_v22, %v2032_v23 }
  0xa9   :  { %v3290_v37 = vadd.f32 %v1487_v32, %v1460_v33  ;;  %v1434_v41 = vadd.f32 %v1433_v35, %v1406_v36  ;;  %v2031_v33 = vor.u32 %v2609_v21, %v2030_v20  ;;  %v1915_v20 = vor.u32 %v2570_v11, %v1912_v12 }
  0xae   :  { %v1461_v51 = vpop.f32.mrf.mxu2  ;;  %v1408_v56 = vpop.f32.mrf.mxu0 }
  0xaf   :  { %v1489_v52 = vpop.f32.mrf.mxu3  ;;  %v1462_v55 = vadd.f32 %v1461_v51, %v1434_v41  ;;  %v1436_v57 = vpop.f32.mrf.mxu1  ;;  %v1409_v60 = vadd.f32 %v3247_v9, %v1408_v56  ;;  %v492_v51 = vunpack.c.l.b16 %v67_v46  ;;  %v555_v56 = vpack.c.b16 %v491_v50, %v491_v50 }
  0xb1   :  { %v3329_v61 = vadd.f32 %v1489_v52, %v1462_v55  ;;  %v1437_v63 = vadd.f32 %v1436_v57, %v1409_v60  ;;  %1631 = vmatmul.bf16.gmra.mxu0 %v1959_v53  ;;  %v493_v52 = vunpack.c.h.b16 %v67_v46  ;;  %v554_v55 = vpack.c.b16 %v490_v49, %v490_v49 }
  0xb2   :  { %1659 = vmatmul.bf16.gmra.mxu1 %v1963_v54  ;;  %v556_v60 = vpack.c.b16 %v492_v51, %v492_v51 }
  0xb3   :  { %1687 = vmatmul.bf16.gmra.mxu2 %v1967_v58  ;;  %v557_v62 = vpack.c.b16 %v493_v52, %v493_v52 }
  0xb4   :  { %1715 = vmatmul.bf16.gmra.mxu3 %v1971_v59 }
  0xb6   :  { %v1464_v3 = vpop.f32.mrf.mxu2  ;;  %v1410_v6 = vpop.f32.mrf.mxu0 }
  0xb7   :  { %v1492_v4 = vpop.f32.mrf.mxu3  ;;  %v1465_v5 = vadd.f32 %v1464_v3, %v1437_v63  ;;  %v1438_v7 = vpop.f32.mrf.mxu1  ;;  %v1411_v8 = vadd.f32 %v3247_v9, %v1410_v6 }
  0xb9   :  { %v3344_v10 = vadd.f32 %v1492_v4, %v1465_v5  ;;  %v1439_v14 = vadd.f32 %v1438_v7, %v1411_v8  ;;  %v1910_v8 = vld [vmem:[%s3564_s0 + $0x30] sm:$0xf] }
  0xbe   :  { %v1466_v24 = vpop.f32.mrf.mxu2  ;;  %v1413_v31 = vpop.f32.mrf.mxu0 }
  0xbf   :  { %v1494_v25 = vpop.f32.mrf.mxu3  ;;  %v1467_v30 = vadd.f32 %v1466_v24, %v1439_v14  ;;  %v1441_v32 = vpop.f32.mrf.mxu1  ;;  %v1414_v35 = vadd.f32 %v3247_v9, %v1413_v31  ;;  %v2579_v14 = vld [vmem:[%s3564_s0 + $0x74] sm:$0xf0]  ;;  %v1923_v24 = vor.u32 %v2571_v15, %v1920_v16 }
  0xc0   :  { %v1919_v23 = vor.u32 %v2579_v14, %v1918_v13 }
  0xc1   :  { %v3389_v36 = vadd.f32 %v1494_v25, %v1467_v30  ;;  %v1442_v38 = vadd.f32 %v1441_v32, %v1414_v35  ;;  %1636 = vmatmul.bf16.gmra.mxu0 %v2023_v26  ;;  %v1974_v35 = vld [vmem:[%s3564_s0 + $0xb0] sm:$0xf] }
  0xc2   :  { %1664 = vmatmul.bf16.gmra.mxu1 %v2027_v27 }
  0xc3   :  { %1692 = vmatmul.bf16.gmra.mxu2 %v2031_v33 }
  0xc4   :  { %1720 = vmatmul.bf16.gmra.mxu3 %v2035_v34 }
  0xc6   :  { %v1469_v39 = vpop.f32.mrf.mxu2  ;;  %v1415_v42 = vpop.f32.mrf.mxu0 }
  0xc7   :  { %v1497_v40 = vpop.f32.mrf.mxu3  ;;  %v1470_v41 = vadd.f32 %v1469_v39, %v1442_v38  ;;  %v1443_v43 = vpop.f32.mrf.mxu1  ;;  %v1416_v45 = vadd.f32 %v3247_v9, %v1415_v42  ;;  %v2586_v38 = vld [vmem:[%s3564_s0 + $0xb4] sm:$0xf]  ;;  %v1984_v42 = vld [vmem:[%s3564_s0 + $0xf8] sm:$0xf0] }
  0xc8   :  { %v1976_v39 = vld [vmem:[%s3564_s0 + $0xf0] sm:$0xf0] }
  0xc9   :  { %v3398_v47 = vadd.f32 %v1497_v40, %v1470_v41  ;;  %v1444_v48 = vadd.f32 %v1443_v43, %v1416_v45  ;;  %v2595_v40 = vld [vmem:[%s3564_s0 + $0xf4] sm:$0xf0]  ;;  %v2587_v41 = vld [vmem:[%s3564_s0 + $0xbc] sm:$0xf]  ;;  %v1979_v46 = vor.u32 %v2586_v38, %v1976_v39 }
  0xca   :  { %v1987_v52 = vor.u32 %v2587_v41, %v1984_v42 }
  0xce   :  { %v1471_v53 = vpop.f32.mrf.mxu2  ;;  %v1418_v58 = vpop.f32.mrf.mxu0 }
  0xcf   :  { %v1499_v54 = vpop.f32.mrf.mxu3  ;;  %v1472_v57 = vadd.f32 %v1471_v53, %v1444_v48  ;;  %v1446_v59 = vpop.f32.mrf.mxu1  ;;  %v1419_v63 = vadd.f32 %v3247_v9, %v1418_v58  ;;  %v2578_v9 = vld [vmem:[%s3564_s0 + $0x6c] sm:$0xf0] }
  0xd0   :  { %v1911_v19 = vor.u32 %v2578_v9, %v1910_v8  ;;  %v2048_v8 = vld [vmem:[%s3564_s0 + $0x178] sm:$0xf0] }
  0xd1   :  { %v3401_v0 = vadd.f32 %v1499_v54, %v1472_v57  ;;  %v1447_v1 = vadd.f32 %v1446_v59, %v1419_v63  ;;  %1641 = vmatmul.bf16.gmra.mxu0 %v554_v55 }
  0xd2   :  { %1669 = vmatmul.bf16.gmra.mxu1 %v555_v56 }
  0xd3   :  { %1697 = vmatmul.bf16.gmra.mxu2 %v556_v60 }
  0xd4   :  { %1725 = vmatmul.bf16.gmra.mxu3 %v557_v62 }
  0xd6   :  { %v1474_v2 = vpop.f32.mrf.mxu2  ;;  %v1420_v5 = vpop.f32.mrf.mxu0 }
  0xd7   :  { %v1502_v3 = vpop.f32.mrf.mxu3  ;;  %v1475_v4 = vadd.f32 %v1474_v2, %v1447_v1  ;;  %v1448_v6 = vpop.f32.mrf.mxu1  ;;  %v2610_v2 = vld [vmem:[%s3564_s0 + $0x16c] sm:$0xf0]  ;;  %v2611_v5 = vld [vmem:[%s3564_s0 + $0x174] sm:$0xf0] }
  0xd8   :  { %v2603_v6 = vld [vmem:[%s3564_s0 + $0x13c] sm:$0xf] }
  0xd9   :  { %v3403_v7 = vadd.f32 %v1502_v3, %v1475_v4  ;;  %v2602_v3 = vld [vmem:[%s3564_s0 + $0x134] sm:$0xf] }
  0xda   :  { %v2040_v4 = vld [vmem:[%s3564_s0 + $0x170] sm:$0xf0] }
  0xdb   :  { %v2043_v13 = vor.u32 %v2602_v3, %v2040_v4 }
  0xde   :  { %v1476_v17 = vpop.f32.mrf.mxu2  ;;  %v1515_v21 = vpop.f32.mrf.mxu0 }
  0xdf   :  { %v1504_v18 = vpop.f32.mrf.mxu3  ;;  %v1543_v22 = vpop.f32.mrf.mxu1  ;;  %v1516_v25 = vadd.f32 %v1515_v21, %v3290_v37  ;;  %v2594_v37 = vld [vmem:[%s3564_s0 + $0xec] sm:$0xf0] }
  0xe0   :  { %v1975_v45 = vor.u32 %v2594_v37, %v1974_v35  ;;  %v2051_v18 = vor.u32 %v2603_v6, %v2048_v8 }
  0xe1   :  { %v1544_v26 = vadd.f32 %v1543_v22, %v1516_v25  ;;  %1738 = vmatmul.bf16.vlgmr.msrb.gmra.mxu0 %v1911_v19 }
  0xe2   :  { %1766 = vmatmul.bf16.vlgmr.msrb.gmra.mxu1 %v1915_v20 }
  0xe3   :  { %1794 = vmatmul.bf16.vlgmr.msrb.gmra.mxu2 %v1919_v23 }
  0xe4   :  { %1822 = vmatmul.bf16.vlgmr.msrb.gmra.mxu3 %v1923_v24 }
  0xe6   :  { %v1571_v27 = vpop.f32.mrf.mxu2  ;;  %v1517_v30 = vpop.f32.mrf.mxu0 }
  0xe7   :  { %v1599_v28 = vpop.f32.mrf.mxu3  ;;  %v1572_v29 = vadd.f32 %v1571_v27, %v1544_v26  ;;  %v1545_v31 = vpop.f32.mrf.mxu1  ;;  %v1518_v32 = vadd.f32 %v1517_v30, %v3329_v61  ;;  %v1982_v61 = vld [vmem:[%s3564_s0 + $0xb8] sm:$0xf]  ;;  %v68_v27 = vld [vmem:[%s3564_s0 + $0x1b0] sm:$0xff] }
  0xe8   :  { %v1983_v51 = vor.u32 %v2595_v40, %v1982_v61 }
  0xe9   :  { %v3431_v33 = vadd.f32 %v1599_v28, %v1572_v29  ;;  %v1546_v34 = vadd.f32 %v1545_v31, %v1518_v32  ;;  %v494_v31 = vunpack.c.l.b16 %v68_v27  ;;  %v495_v32 = vunpack.c.h.b16 %v68_v27 }
  0xeb   :  { %v558_v39 = vpack.c.b16 %v494_v31, %v494_v31  ;;  %v559_v61 = vpack.c.b16 %v495_v32, %v495_v32 }
  0xee   :  { %v1573_v43 = vpop.f32.mrf.mxu2  ;;  %v1520_v49 = vpop.f32.mrf.mxu0 }
  0xef   :  { %v1601_v44 = vpop.f32.mrf.mxu3  ;;  %v1574_v48 = vadd.f32 %v1573_v43, %v1546_v34  ;;  %v1548_v50 = vpop.f32.mrf.mxu1  ;;  %v1521_v53 = vadd.f32 %v1520_v49, %v3344_v10  ;;  %v2038_v10 = vld [vmem:[%s3564_s0 + $0x130] sm:$0xf] }
  0xf0   :  { %v2039_v12 = vor.u32 %v2610_v2, %v2038_v10 }
  0xf1   :  { %v3458_v54 = vadd.f32 %v1601_v44, %v1574_v48  ;;  %v1549_v55 = vadd.f32 %v1548_v50, %v1521_v53  ;;  %1743 = vmatmul.bf16.gmra.mxu0 %v1975_v45 }
  0xf2   :  { %1771 = vmatmul.bf16.gmra.mxu1 %v1979_v46 }
  0xf3   :  { %1799 = vmatmul.bf16.gmra.mxu2 %v1983_v51 }
  0xf4   :  { %1827 = vmatmul.bf16.gmra.mxu3 %v1987_v52 }
  0xf6   :  { %v1576_v56 = vpop.f32.mrf.mxu2  ;;  %v1522_v59 = vpop.f32.mrf.mxu0 }
  0xf7   :  { %v1604_v57 = vpop.f32.mrf.mxu3  ;;  %v1577_v58 = vadd.f32 %v1576_v56, %v1549_v55  ;;  %v1550_v60 = vpop.f32.mrf.mxu1  ;;  %v1523_v62 = vadd.f32 %v1522_v59, %v3389_v36  ;;  %v2046_v36 = vld [vmem:[%s3564_s0 + $0x138] sm:$0xf] }
  0xf8   :  { %v2047_v17 = vor.u32 %v2611_v5, %v2046_v36 }
  0xf9   :  { %v3461_v63 = vadd.f32 %v1604_v57, %v1577_v58  ;;  %v1551_v1 = vadd.f32 %v1550_v60, %v1523_v62 }
  0xfe   :  { %v1578_v9 = vpop.f32.mrf.mxu2  ;;  %v1525_v15 = vpop.f32.mrf.mxu0 }
  0xff   :  { %v1606_v11 = vpop.f32.mrf.mxu3  ;;  %v1579_v14 = vadd.f32 %v1578_v9, %v1551_v1  ;;  %v1553_v16 = vpop.f32.mrf.mxu1  ;;  %v1526_v19 = vadd.f32 %v1525_v15, %v3398_v47  ;;  %v69_v47 = vld [vmem:[%s3564_s0 + $0x1b8] sm:$0xff] }
 0x100   :  { %v496_v34 = vunpack.c.l.b16 %v69_v47  ;;  %v497_v35 = vunpack.c.h.b16 %v69_v47 }
 0x101   :  { %v3488_v20 = vadd.f32 %v1606_v11, %v1579_v14  ;;  %v1554_v21 = vadd.f32 %v1553_v16, %v1526_v19  ;;  %1748 = vmatmul.bf16.gmra.mxu0 %v2039_v12 }
 0x102   :  { %1776 = vmatmul.bf16.gmra.mxu1 %v2043_v13  ;;  %v560_v43 = vpack.c.b16 %v496_v34, %v496_v34 }
 0x103   :  { %1804 = vmatmul.bf16.gmra.mxu2 %v2047_v17 }
 0x104   :  { %1832 = vmatmul.bf16.gmra.mxu3 %v2051_v18 }
 0x106   :  { %v1581_v22 = vpop.f32.mrf.mxu2  ;;  %v1527_v25 = vpop.f32.mrf.mxu0 }
 0x107   :  { %v1609_v23 = vpop.f32.mrf.mxu3  ;;  %v1582_v24 = vadd.f32 %v1581_v22, %v1554_v21  ;;  %v1555_v26 = vpop.f32.mrf.mxu1  ;;  %v1528_v28 = vadd.f32 %v1527_v25, %v3401_v0  ;;  %v561_v0 = vpack.c.b16 %v497_v35, %v497_v35 }
 0x109   :  { %v3497_v29 = vadd.f32 %v1609_v23, %v1582_v24  ;;  %v1556_v30 = vadd.f32 %v1555_v26, %v1528_v28 }
 0x10e   :  { %v1583_v37 = vpop.f32.mrf.mxu2  ;;  %v1530_v41 = vpop.f32.mrf.mxu0 }
 0x10f   :  { %v1611_v38 = vpop.f32.mrf.mxu3  ;;  %v1584_v40 = vadd.f32 %v1583_v37, %v1556_v30  ;;  %v1558_v42 = vpop.f32.mrf.mxu1  ;;  %v1531_v44 = vadd.f32 %v1530_v41, %v3403_v7 }
 0x111   :  { %v3500_v45 = vadd.f32 %v1611_v38, %v1584_v40  ;;  %v1559_v46 = vadd.f32 %v1558_v42, %v1531_v44  ;;  %1753 = vmatmul.bf16.gmra.mxu0 %v558_v39 }
 0x112   :  { %1781 = vmatmul.bf16.gmra.mxu1 %v559_v61 }
 0x113   :  { %1809 = vmatmul.bf16.gmra.mxu2 %v560_v43 }
 0x114   :  { %1837 = vmatmul.bf16.gmra.mxu3 %v561_v0 }
 0x116   :  { %v1586_v48 = vpop.f32.mrf.mxu2  ;;  %v1532_v51 = vpop.f32.mrf.mxu0 }
 0x117   :  { %v1614_v49 = vpop.f32.mrf.mxu3  ;;  %v1587_v50 = vadd.f32 %v1586_v48, %v1559_v46  ;;  %v1560_v52 = vpop.f32.mrf.mxu1 }
 0x119   :  { %v3502_v53 = vadd.f32 %v1614_v49, %v1587_v50 }
 0x11e   :  { %v1588_v55 = vpop.f32.mrf.mxu2  ;;  %v1627_v57 = vpop.f32.mrf.mxu0 }
 0x11f   :  { %v1616_v56 = vpop.f32.mrf.mxu3  ;;  %v1655_v58 = vpop.f32.mrf.mxu1  ;;  %v1628_v22 = vadd.f32 %v1627_v57, %v3431_v33 }
 0x121   :  { %v1656_v27 = vadd.f32 %v1655_v58, %v1628_v22 }
 0x126   :  { %v1683_v59 = vpop.f32.mrf.mxu2  ;;  %v1629_v60 = vpop.f32.mrf.mxu0 }
 0x127   :  { %v1711_v7 = vpop.f32.mrf.mxu3  ;;  %v1657_v62 = vpop.f32.mrf.mxu1  ;;  %v1684_v28 = vadd.f32 %v1683_v59, %v1656_v27  ;;  %v1630_v47 = vadd.f32 %v1629_v60, %v3458_v54 }
 0x129   :  { %v1712_v32 = vadd.f32 %v1711_v7, %v1684_v28  ;;  %v1658_v37 = vadd.f32 %v1657_v62, %v1630_v47 }
 0x12e   :  { %v1685_v1 = vpop.f32.mrf.mxu2  ;;  %v1632_v2 = vpop.f32.mrf.mxu0 }
 0x12f   :  { %v1713_v10 = vpop.f32.mrf.mxu3  ;;  %v1660_v3 = vpop.f32.mrf.mxu1  ;;  %v1686_v39 = vadd.f32 %v1685_v1, %v1658_v37  ;;  %v1633_v33 = vadd.f32 %v1632_v2, %v3461_v63 }
 0x131   :  { %v1714_v42 = vadd.f32 %v1713_v10, %v1686_v39  ;;  %v1661_v46 = vadd.f32 %v1660_v3, %v1633_v33 }
 0x136   :  { %v1688_v4 = vpop.f32.mrf.mxu2  ;;  %v1634_v5 = vpop.f32.mrf.mxu0 }
 0x137   :  { %v1716_v36 = vpop.f32.mrf.mxu3  ;;  %v1662_v6 = vpop.f32.mrf.mxu1  ;;  %v1689_v49 = vadd.f32 %v1688_v4, %v1661_v46  ;;  %v1635_v51 = vadd.f32 %v1634_v5, %v3488_v20 }
 0x139   :  { %v1717_v56 = vadd.f32 %v1716_v36, %v1689_v49  ;;  %v1663_v7 = vadd.f32 %v1662_v6, %v1635_v51 }
 0x13e   :  { %v1690_v8 = vpop.f32.mrf.mxu2  ;;  %v1637_v11 = vpop.f32.mrf.mxu0 }
 0x13f   :  { %v1718_v9 = vpop.f32.mrf.mxu3  ;;  %v1665_v12 = vpop.f32.mrf.mxu1  ;;  %v1691_v1 = vadd.f32 %v1690_v8, %v1663_v7  ;;  %v1638_v2 = vadd.f32 %v1637_v11, %v3497_v29 }
 0x141   :  { %v1719_v5 = vadd.f32 %v1718_v9, %v1691_v1 }
 0x146   :  { %v3504_v13 = vpop.f32.mrf.mxu2  ;;  %v3508_v15 = vpop.f32.mrf.mxu0 }
 0x147   :  { %v3506_v14 = vpop.f32.mrf.mxu3  ;;  %v3510_v16 = vpop.f32.mrf.mxu1  ;;  %v1640_v29 = vadd.f32 %v3508_v15, %v3500_v45 }
 0x14e   :  { %v3512_v17 = vpop.f32.mrf.mxu2  ;;  %v3516_v19 = vpop.f32.mrf.mxu0 }
 0x14f   :  { %v3514_v18 = vpop.f32.mrf.mxu3  ;;  %v3518_v21 = vpop.f32.mrf.mxu1  ;;  %v1643_v45 = vadd.f32 %v3516_v19, %v3502_v53 }
 0x156   :  { %v3521_v23 = vpop.f32.mrf.mxu2  ;;  %v1644_v25 = vpop.f32.mrf.mxu0 }
 0x157   :  { %v3523_v24 = vpop.f32.mrf.mxu3  ;;  %v1672_v26 = vpop.f32.mrf.mxu1 }
 0x158   :  { %v1666_v26 = vadd.f32 %v1665_v12, %v1638_v2 }
 0x15a   :  { %v1694_v28 = vadd.f32 %v3504_v13, %v1666_v26 }
 0x15c   :  { %v1722_v9 = vadd.f32 %v3506_v14, %v1694_v28 }
 0x15e   :  { %v1700_v30 = vpop.f32.mrf.mxu2  ;;  %v1739_v34 = vpop.f32.mrf.mxu0 }
 0x15f   :  { %v1728_v31 = vpop.f32.mrf.mxu3  ;;  %v1767_v35 = vpop.f32.mrf.mxu1  ;;  %v1740_v38 = vadd.f32 %v1739_v34, %v1712_v32  ;;  %v1668_v34 = vadd.f32 %v3510_v16, %v1640_v29 }
 0x161   :  { %v1768_v61 = vadd.f32 %v1767_v35, %v1740_v38  ;;  %v1696_v37 = vadd.f32 %v3512_v17, %v1668_v34 }
 0x163   :  { %v1724_v33 = vadd.f32 %v3514_v18, %v1696_v37 }
 0x166   :  { %v1795_v40 = vpop.f32.mrf.mxu2  ;;  %v1741_v0 = vpop.f32.mrf.mxu0 }
 0x167   :  { %v1823_v41 = vpop.f32.mrf.mxu3  ;;  %v1796_v43 = vadd.f32 %v1795_v40, %v1768_v61  ;;  %v1769_v44 = vpop.f32.mrf.mxu1  ;;  %v1742_v54 = vadd.f32 %v1741_v0, %v1714_v42 }
 0x169   :  { %v1824_v48 = vadd.f32 %v1823_v41, %v1796_v43  ;;  %v1770_v52 = vadd.f32 %v1769_v44, %v1742_v54  ;;  %v1671_v41 = vadd.f32 %v3518_v21, %v1643_v45 }
 0x16b   :  { %v1842_v50 = vmax.f32 %v1824_v48, 0.0  ;;  %v1699_v43 = vadd.f32 %v3521_v23, %v1671_v41 }
 0x16d   :  { %1849 = vst [vmem:[%s3565_s3] sm:$0xff] %v1842_v50  ;;  %v1727_v46 = vadd.f32 %v3523_v24, %v1699_v43 }
 0x16e   :  { %v1797_v63 = vpop.f32.mrf.mxu2  ;;  %v1744_v58 = vpop.f32.mrf.mxu0 }
 0x16f   :  { %v1825_v55 = vpop.f32.mrf.mxu3  ;;  %v1798_v57 = vadd.f32 %v1797_v63, %v1770_v52  ;;  %v1772_v59 = vpop.f32.mrf.mxu1  ;;  %v1745_v62 = vadd.f32 %v1744_v58, %v1717_v56 }
 0x171   :  { %v1826_v60 = vadd.f32 %v1825_v55, %v1798_v57  ;;  %v1773_v20 = vadd.f32 %v1772_v59, %v1745_v62 }
 0x173   :  { %v1843_v10 = vmax.f32 %v1826_v60, 0.0 }
 0x175   :  { %1850 = vst [vmem:[%s3565_s3 + $0x8] sm:$0xff] %v1843_v10 }
 0x176   :  { %v1800_v3 = vpop.f32.mrf.mxu2  ;;  %v1746_v36 = vpop.f32.mrf.mxu0 }
 0x177   :  { %v1828_v4 = vpop.f32.mrf.mxu3  ;;  %v1801_v22 = vadd.f32 %v1800_v3, %v1773_v20  ;;  %v1774_v25 = vpop.f32.mrf.mxu1  ;;  %v1747_v6 = vadd.f32 %v1746_v36, %v1719_v5 }
 0x179   :  { %v1829_v27 = vadd.f32 %v1828_v4, %v1801_v22  ;;  %v1775_v11 = vadd.f32 %v1774_v25, %v1747_v6 }
 0x17b   :  { %v1844_v8 = vmax.f32 %v1829_v27, 0.0 }
 0x17d   :  { %1851 = vst [vmem:[%s3565_s3 + $0x10] sm:$0xff] %v1844_v8 }
 0x17e   :  { %v1802_v47 = vpop.f32.mrf.mxu2  ;;  %v1749_v32 = vpop.f32.mrf.mxu0 }
 0x17f   :  { %v1830_v30 = vpop.f32.mrf.mxu3  ;;  %v1803_v31 = vadd.f32 %v1802_v47, %v1775_v11  ;;  %v1777_v12 = vpop.f32.mrf.mxu1  ;;  %v1750_v13 = vadd.f32 %v1749_v32, %v1722_v9 }
 0x181   :  { %v1831_v35 = vadd.f32 %v1830_v30, %v1803_v31  ;;  %v1778_v15 = vadd.f32 %v1777_v12, %v1750_v13 }
 0x183   :  { %v1845_v38 = vmax.f32 %v1831_v35, 0.0 }
 0x185   :  { %1852 = vst [vmem:[%s3565_s3 + $0x18] sm:$0xff] %v1845_v38 }
 0x186   :  { %v1805_v39 = vpop.f32.mrf.mxu2  ;;  %v1751_v40 = vpop.f32.mrf.mxu0 }
 0x187   :  { %v1833_v14 = vpop.f32.mrf.mxu3  ;;  %v1806_v61 = vadd.f32 %v1805_v39, %v1778_v15  ;;  %v1779_v16 = vpop.f32.mrf.mxu1  ;;  %v1752_v17 = vadd.f32 %v1751_v40, %v1724_v33 }
 0x189   :  { %v1834_v42 = vadd.f32 %v1833_v14, %v1806_v61  ;;  %v1780_v53 = vadd.f32 %v1779_v16, %v1752_v17 }
 0x18b   :  { %v1846_v0 = vmax.f32 %v1834_v42, 0.0 }
 0x18d   :  { %1853 = vst [vmem:[%s3565_s3 + $0x20] sm:$0xff] %v1846_v0 }
 0x18e   :  { %v1807_v19 = vpop.f32.mrf.mxu2  ;;  %v1754_v48 = vpop.f32.mrf.mxu0 }
 0x18f   :  { %v1835_v44 = vpop.f32.mrf.mxu3  ;;  %v1808_v18 = vadd.f32 %v1807_v19, %v1780_v53  ;;  %v1782_v54 = vpop.f32.mrf.mxu1  ;;  %v1755_v50 = vadd.f32 %v1754_v48, %v1727_v46 }
 0x191   :  { %v1836_v49 = vadd.f32 %v1835_v44, %v1808_v18  ;;  %v1783_v23 = vadd.f32 %v1782_v54, %v1755_v50 }
 0x193   :  { %v1847_v21 = vmax.f32 %v1836_v49, 0.0 }
 0x195   :  { %1854 = vst [vmem:[%s3565_s3 + $0x28] sm:$0xff] %v1847_v21 }
 0x196   :  { %v1810_v51 = vpop.f32.mrf.mxu2  ;;  %v1756_v55 = vpop.f32.mrf.mxu0 }
 0x197   :  { %v1838_v52 = vpop.f32.mrf.mxu3  ;;  %v1811_v63 = vadd.f32 %v1810_v51, %v1783_v23  ;;  %v1784_v56 = vpop.f32.mrf.mxu1 }
 0x199   :  { %v1839_v57 = vadd.f32 %v1838_v52, %v1811_v63 }
 0x19b   :  { %v1848_v58 = vmax.f32 %v1839_v57, 0.0 }
 0x19d   :  { %1855 = vst [vmem:[%s3565_s3 + $0x30] sm:$0xff] %v1848_v58 }
 0x19e   :  { %v1812_v24 = vpop.f32.mrf.mxu2 }
 0x19f   :  { %v1840_v59 = vpop.f32.mrf.mxu3 }

</bundles_post_ra>
